<compile_context>
chip_gen: v5e
topology: v5e:2x2
jax: 0.10.0
libtpu: 0.0.40
codegen_flags: <defaults>
</compile_context>

<pallas_src>
import functools

import numpy as np
import jax
import jax.numpy as jnp
from jax import lax
from jax.experimental import pallas as pl
from jax.experimental.pallas import tpu as pltpu

EPS = 1e-5


# ----------------------- host-side constant builders ------------------------

def _shift_select(N, H_in, kh, stride, pad, H_out):
    """0/1 row-gather matrix S, shape (kh*N*H_out, N*H_in):
    (S @ A)[(ky*N + n)*H_out + a, :] = A[n*H_in + stride*a + ky - pad, :]
    (zero row where the source index falls into zero padding)."""
    S = np.zeros((kh * N * H_out, N * H_in), np.float32)
    for ky in range(kh):
        for n in range(N):
            for a in range(H_out):
                r = stride * a + ky - pad
                if 0 <= r < H_in:
                    S[(ky * N + n) * H_out + a, n * H_in + r] = 1.0
    return S


def _band_weight(w, W_in, stride, pad):
    """Fold the kx / channel contraction (and W zero padding) of a conv into a
    per-ky block-banded matrix.  w: (kh, kw, Ci, Co) -> (kh, W_in*Ci, W_out*Co)."""
    kh, kw, Ci, Co = w.shape
    W_out = (W_in + 2 * pad - kw) // stride + 1
    G = np.zeros((kw, W_in, W_out), np.float32)
    for kx in range(kw):
        for wo in range(W_out):
            win = stride * wo + kx - pad
            if 0 <= win < W_in:
                G[kx, win, wo] = 1.0
    M = np.einsum("kwv,ykic->ywivc", G, np.asarray(w, np.float32))
    return M.reshape(kh, W_in * Ci, W_out * Co)


# ----------------------------- in-kernel helpers -----------------------------

def _row_shift(src, d, H):
    """src[(n*H + h), :] -> src[(n*H + h + d), :], zero where h+d leaves [0, H).
    Sublane roll (XLU) + iota mask (VPU) instead of a K=32 selection matmul."""
    if d == 0:
        return src
    R = src.shape[0]
    rolled = pltpu.roll(src, shift=(-d) % R, axis=0)
    h = lax.broadcasted_iota(jnp.int32, src.shape, 0) % H
    valid = (h >= -d) if d < 0 else (h < H - d)
    return jnp.where(valid, rolled, 0.0)


# --------------------------------- kernel -----------------------------------

def _unet_block_kernel(x_ref, temb_ref, wd_ref, s3_ref, m1_ref, m2_ref, m3_ref,
                       consts_ref, rrow_ref, out_ref, *,
                       H, Cout, NHo, WC, OP, inv_n):
    consts = consts_ref[...]
    selt = consts[0:Cout, 0:WC]                       # (C, W*C) 0/1 channel broadcast
    gamma = consts[Cout:Cout + 1, 0:Cout]             # (1, C)
    beta = consts[Cout + 1:Cout + 2, 0:Cout]          # (1, C)
    bd = consts[Cout + 2:Cout + 3, 0:Cout]            # (1, C)   time-dense bias
    b3 = consts[Cout + 3:Cout + 4, 0:OP]              # (1, OP)  final conv bias (lane-padded)

    def conv3x3(src_f32, m_ref):
        """3x3 pad-1 conv on (N*H, W*Ci) rows: 3 accumulating bf16 matmuls."""
        acc = None
        for ky in range(3):
            shifted = _row_shift(src_f32, ky - 1, H).astype(jnp.bfloat16)
            part = jnp.dot(shifted, m_ref[ky], preferred_element_type=jnp.float32)
            acc = part if acc is None else acc + part
        return acc

    def bn_relu(acc):
        """Training-mode BatchNorm (batch stats, centered two-pass) + ReLU, f32."""
        contract = (((1,), (1,)), ((), ()))           # contract lane axis of both
        s1 = jnp.sum(acc, axis=0, keepdims=True)                              # (1, W*C)
        mean_c = lax.dot_general(s1, selt, contract,
                                 preferred_element_type=jnp.float32) * inv_n  # (1, C)
        xc = acc - jnp.dot(mean_c, selt, preferred_element_type=jnp.float32)
        s2 = jnp.sum(xc * xc, axis=0, keepdims=True)
        var_c = lax.dot_general(s2, selt, contract,
                                preferred_element_type=jnp.float32) * inv_n   # biased var
        scale_c = gamma * lax.rsqrt(var_c + EPS)
        scale = jnp.dot(scale_c, selt, preferred_element_type=jnp.float32)    # (1, W*C)
        shift = jnp.dot(beta, selt, preferred_element_type=jnp.float32)       # (1, W*C)
        return jnp.maximum(xc * scale + shift, 0.0)

    # conv1 (3x3, pad 1) + BN(batch stats) + ReLU.  Conv bias dropped: BN centering cancels it.
    h = bn_relu(conv3x3(x_ref[...], m1_ref))

    # + relu(Linear(time_embedding)) broadcast over (H, W)
    tf = jnp.maximum(jnp.dot(temb_ref[...], wd_ref[...],
                             preferred_element_type=jnp.float32) + bd, 0.0)   # (N, C)
    tf = jnp.dot(tf, selt, preferred_element_type=jnp.float32)                # (N, W*C)
    h = h + jnp.dot(rrow_ref[...], tf, preferred_element_type=jnp.float32)    # (N*H, W*C)

    # conv2 (3x3, pad 1) + BN + ReLU (same gamma/beta, fresh batch stats)
    h = bn_relu(conv3x3(h, m2_ref))

    # spatial_transform: conv 4x4, stride 2, pad 1 (+ bias).  Stride-2 row gather via s3,
    # kx/channel contraction via m3 whose output lanes are zero-padded to OP (=128)
    # so the final store is unmasked full-lane.
    g = jnp.dot(s3_ref[...], h.astype(jnp.bfloat16),
                preferred_element_type=jnp.float32).astype(jnp.bfloat16)      # (4*N*Ho, W*C)
    acc = None
    for ky in range(4):
        part = jnp.dot(g[ky * NHo:(ky + 1) * NHo, :], m3_ref[ky],
                       preferred_element_type=jnp.float32)
        acc = part if acc is None else acc + part
    out_ref[...] = acc + b3


# ------------------------------ JAX wrapper ----------------------------------

def unet_block_forward(x_nchw, time_embedding, p):
    """UNetBlock.forward (is_upsample=False). x: (N, Cin, H, W) -> (N, Cout, H/2, W/2)."""
    N, Cin, H, W = x_nchw.shape
    Cout = p["gamma"].shape[0]
    Ho = (H + 2 - 4) // 2 + 1
    Wo = (W + 2 - 4) // 2 + 1

    lane = 128
    k1 = W * Cin
    k1p = ((k1 + lane - 1) // lane) * lane                 # conv1 K padded to 128 lanes
    op = ((Wo * Cout + lane - 1) // lane) * lane           # output lanes padded to 128
    WC = W * Cout

    # lane-dense (N*H, W*C) activation layout (channels fastest), lane-padded input
    x2d = jnp.transpose(x_nchw, (0, 2, 3, 1)).reshape(N * H, k1).astype(jnp.float32)
    x2d = jnp.pad(x2d, ((0, 0), (0, k1p - k1)))

    # host-precomputed folded weights / gather constants (computed once per parameter set)
    m1 = _band_weight(np.asarray(p["w1"], np.float32), W, 1, 1)          # (3, W*Cin, W*Cout)
    m1 = np.pad(m1, ((0, 0), (0, k1p - k1), (0, 0)))
    m2 = _band_weight(np.asarray(p["w2"], np.float32), W, 1, 1)          # (3, W*Cout, W*Cout)
    m3 = _band_weight(np.asarray(p["w3"], np.float32), W, 2, 1)          # (4, W*Cout, Wo*Cout)
    m3 = np.pad(m3, ((0, 0), (0, 0), (0, op - Wo * Cout)))               # lane-pad output
    s3 = _shift_select(N, H, kh=4, stride=2, pad=1, H_out=Ho)            # (4*N*Ho, N*H)
    rrow = np.kron(np.eye(N, dtype=np.float32),
                   np.ones((H, 1), np.float32))                          # (N*H, N) H-broadcast

    # one coalesced f32 constants slab: selt + gamma/beta/bd/b3
    CW = max(WC, op)
    nrows = ((Cout + 4 + 7) // 8) * 8
    consts = np.zeros((nrows, CW), np.float32)
    consts[0:Cout, 0:WC] = np.tile(np.eye(Cout, dtype=np.float32), (1, W))
    consts[Cout, 0:Cout] = np.asarray(p["gamma"], np.float32)
    consts[Cout + 1, 0:Cout] = np.asarray(p["beta"], np.float32)
    consts[Cout + 2, 0:Cout] = np.asarray(p["bd"], np.float32)
    consts[Cout + 3, 0:Wo * Cout] = np.tile(np.asarray(p["b3"], np.float32), Wo)

    kernel = functools.partial(
        _unet_block_kernel,
        H=H, Cout=Cout, NHo=N * Ho, WC=WC, OP=op, inv_n=1.0 / float(N * H * W))

    y = pl.pallas_call(
        kernel,
        out_shape=jax.ShapeDtypeStruct((N * Ho, op), jnp.float32),
        in_specs=[pl.BlockSpec(memory_space=pltpu.MemorySpace.VMEM) for _ in range(9)],
        out_specs=pl.BlockSpec(memory_space=pltpu.MemorySpace.VMEM),
    )(x2d,
      jnp.asarray(time_embedding, jnp.bfloat16),
      jnp.asarray(p["wd"], jnp.bfloat16),
      jnp.asarray(s3, jnp.bfloat16),
      jnp.asarray(m1, jnp.bfloat16),
      jnp.asarray(m2, jnp.bfloat16),
      jnp.asarray(m3, jnp.bfloat16),
      jnp.asarray(consts, jnp.float32),
      jnp.asarray(rrow, jnp.float32))

    y = y[:, :Wo * Cout].reshape(N, Ho, Wo, Cout)
    return jnp.transpose(y, (0, 3, 1, 2))                                # NHWC -> NCHW


# -------------------------- params & pure-JAX reference ----------------------

def init_params(key, Cin, Cout, T):
    ks = jax.random.split(key, 10)
    return {
        "w1": jax.random.normal(ks[0], (3, 3, Cin, Cout), jnp.float32) * 0.2,
        "b1": jax.random.normal(ks[1], (Cout,), jnp.float32) * 0.1,
        "wd": jax.random.normal(ks[2], (T, Cout), jnp.float32) * 0.2,
        "bd": jax.random.normal(ks[3], (Cout,), jnp.float32) * 0.1,
        "w2": jax.random.normal(ks[4], (3, 3, Cout, Cout), jnp.float32) * 0.2,
        "b2": jax.random.normal(ks[5], (Cout,), jnp.float32) * 0.1,
        "w3": jax.random.normal(ks[6], (4, 4, Cout, Cout), jnp.float32) * 0.2,
        "b3": jax.random.normal(ks[7], (Cout,), jnp.float32) * 0.1,
        "gamma": 1.0 + 0.1 * jax.random.normal(ks[8], (Cout,), jnp.float32),
        "beta": 0.1 * jax.random.normal(ks[9], (Cout,), jnp.float32),
    }


def reference_forward(x_nchw, temb, p):
    def conv(x, w_khwio, b, stride, pad):
        w = jnp.transpose(w_khwio, (3, 2, 0, 1))  # (kh,kw,Ci,Co) -> OIHW
        y = lax.conv_general_dilated(
            x, w, window_strides=(stride, stride),
            padding=[(pad, pad), (pad, pad)],
            dimension_numbers=("NCHW", "OIHW", "NCHW"),
            precision=lax.Precision.HIGHEST)
        return y + b[None, :, None, None]

    def bn(x, gamma, beta):
        mean = jnp.mean(x, axis=(0, 2, 3), keepdims=True)
        var = jnp.mean((x - mean) ** 2, axis=(0, 2, 3), keepdims=True)  # biased (train mode)
        return ((x - mean) / jnp.sqrt(var + EPS)) * gamma[None, :, None, None] \
               + beta[None, :, None, None]

    h = jax.nn.relu(bn(conv(x_nchw, p["w1"], p["b1"], 1, 1), p["gamma"], p["beta"]))
    tf = jax.nn.relu(temb @ p["wd"] + p["bd"])
    h = h + tf[:, :, None, None]
    h = jax.nn.relu(bn(conv(h, p["w2"], p["b2"], 1, 1), p["gamma"], p["beta"]))
    return conv(h, p["w3"], p["b3"], 2, 1)


# ----------------------------------- main ------------------------------------

if __name__ == "__main__":
    key = jax.random.PRNGKey(0)
    kx, kt, kp = jax.random.split(key, 3)

    N, Cin, Cout, T, H, W = 2, 4, 8, 32, 16, 16
    x = jax.random.normal(kx, (N, Cin, H, W), jnp.float32)
    temb = jax.random.normal(kt, (N, T), jnp.float32)
    params = init_params(kp, Cin, Cout, T)

    y = unet_block_forward(x, temb, params)
    y = jax.block_until_ready(y)
    assert y.shape == (N, Cout, H // 2, W // 2)

    # bf16 MXU operands vs. an f32 HIGHEST-precision reference across 3 convs + 2 BNs.
    y_ref = reference_forward(x, temb, params)
    np.testing.assert_allclose(np.asarray(y), np.asarray(y_ref), atol=5e-2, rtol=5e-2)

    # TODO(synk): BatchNorm running-stat buffer updates (training-mode side effect) are
    # not modeled; the forward output in train mode does not depend on them.
    print("KERNEL_OK")
</pallas_src>

<mosaic_0001>
module attributes {stable_mosaic.version = 11 : i64} {
  func.func @_unet_block_kernel(%arg0: memref<32x128xf32, #tpu.memory_space<vmem>>, %arg1: memref<2x32xbf16, #tpu.memory_space<vmem>>, %arg2: memref<32x8xbf16, #tpu.memory_space<vmem>>, %arg3: memref<64x32xbf16, #tpu.memory_space<vmem>>, %arg4: memref<3x128x128xbf16, #tpu.memory_space<vmem>>, %arg5: memref<3x128x128xbf16, #tpu.memory_space<vmem>>, %arg6: memref<4x128x128xbf16, #tpu.memory_space<vmem>>, %arg7: memref<16x128xf32, #tpu.memory_space<vmem>>, %arg8: memref<32x2xf32, #tpu.memory_space<vmem>>, %arg9: memref<16x128xf32, #tpu.memory_space<vmem>>) attributes {dimension_semantics = [], scalar_prefetch = 0 : i64, scratch_operands = 0 : i64, tpu.core_type = #tpu.core_type<tc>} {
    %c0 = arith.constant 0 : index
    %c0_0 = arith.constant 0 : index
    %0 = vector.load %arg7[%c0, %c0_0] : memref<16x128xf32, #tpu.memory_space<vmem>>, vector<16x128xf32>
    %1 = vector.extract_strided_slice %0 {offsets = [0, 0], sizes = [8, 128], strides = [1, 1]} : vector<16x128xf32> to vector<8x128xf32>
    %2 = vector.extract_strided_slice %0 {offsets = [8, 0], sizes = [1, 8], strides = [1, 1]} : vector<16x128xf32> to vector<1x8xf32>
    %3 = vector.extract_strided_slice %0 {offsets = [9, 0], sizes = [1, 8], strides = [1, 1]} : vector<16x128xf32> to vector<1x8xf32>
    %4 = vector.extract_strided_slice %0 {offsets = [10, 0], sizes = [1, 8], strides = [1, 1]} : vector<16x128xf32> to vector<1x8xf32>
    %5 = vector.extract_strided_slice %0 {offsets = [11, 0], sizes = [1, 128], strides = [1, 1]} : vector<16x128xf32> to vector<1x128xf32>
    %c0_1 = arith.constant 0 : index
    %c0_2 = arith.constant 0 : index
    %6 = vector.load %arg0[%c0_1, %c0_2] : memref<32x128xf32, #tpu.memory_space<vmem>>, vector<32x128xf32>
    %c1_i32 = arith.constant 1 : i32
    %7 = tpu.dynamic_rotate %6 by %c1_i32 dim 0 : vector<32x128xf32>, i32 -> vector<32x128xf32>
    %8 = tpu.iota {dimensions = array<i32: 0>} : vector<32x128xi32>
    %c16_i32 = arith.constant 16 : i32
    %c0_i32 = arith.constant 0 : i32
    %9 = arith.cmpi eq, %c16_i32, %c0_i32 : i32
    %c1_i32_3 = arith.constant 1 : i32
    %10 = arith.select %9, %c1_i32_3, %c16_i32 : i32
    %11 = vector.broadcast %10 : i32 to vector<32x128xi32>
    %12 = arith.remsi %8, %11 : vector<32x128xi32>
    %c0_i32_4 = arith.constant 0 : i32
    %13 = vector.broadcast %c0_i32_4 : i32 to vector<32x128xi32>
    %14 = arith.cmpi ne, %12, %13 : vector<32x128xi32>
    %c0_i32_5 = arith.constant 0 : i32
    %15 = vector.broadcast %c0_i32_5 : i32 to vector<32x128xi32>
    %16 = arith.cmpi slt, %12, %15 : vector<32x128xi32>
    %c0_i32_6 = arith.constant 0 : i32
    %17 = arith.cmpi slt, %10, %c0_i32_6 : i32
    %18 = vector.broadcast %17 : i1 to vector<32x128xi1>
    %19 = vector.broadcast %18 : vector<32x128xi1> to vector<32x128xi1>
    %20 = arith.xori %16, %19 : vector<32x128xi1>
    %21 = arith.andi %20, %14 : vector<32x128xi1>
    %22 = vector.broadcast %10 : i32 to vector<32x128xi32>
    %23 = arith.addi %12, %22 : vector<32x128xi32>
    %24 = arith.select %21, %23, %12 : vector<32x128xi1>, vector<32x128xi32>
    %c1_i32_7 = arith.constant 1 : i32
    %25 = vector.broadcast %c1_i32_7 : i32 to vector<32x128xi32>
    %26 = arith.cmpi sge, %24, %25 : vector<32x128xi32>
    %cst = arith.constant 0.000000e+00 : f32
    %27 = vector.broadcast %cst : f32 to vector<32x128xf32>
    %28 = arith.select %26, %7, %27 : vector<32x128xi1>, vector<32x128xf32>
    %29 = arith.truncf %28 : vector<32x128xf32> to vector<32x128xbf16>
    %c0_8 = arith.constant 0 : index
    %c0_9 = arith.constant 0 : index
    %c0_10 = arith.constant 0 : index
    %30 = vector.load %arg4[%c0_8, %c0_9, %c0_10] : memref<3x128x128xbf16, #tpu.memory_space<vmem>>, vector<1x128x128xbf16>
    %31 = vector.shape_cast %30 : vector<1x128x128xbf16> to vector<128x128xbf16>
    %cst_11 = arith.constant dense<0.000000e+00> : vector<32x128xf32>
    %32 = tpu.matmul %29, %31, %cst_11 {dimension_numbers = #tpu.dot_dimension_numbers<[1], [0], [0], [1], [0, 0, 1, 1], [], []>} : vector<32x128xbf16>, vector<128x128xbf16>, vector<32x128xf32> -> vector<32x128xf32>
    %33 = arith.truncf %6 : vector<32x128xf32> to vector<32x128xbf16>
    %c1 = arith.constant 1 : index
    %c0_12 = arith.constant 0 : index
    %c0_13 = arith.constant 0 : index
    %34 = vector.load %arg4[%c1, %c0_12, %c0_13] : memref<3x128x128xbf16, #tpu.memory_space<vmem>>, vector<1x128x128xbf16>
    %35 = vector.shape_cast %34 : vector<1x128x128xbf16> to vector<128x128xbf16>
    %cst_14 = arith.constant dense<0.000000e+00> : vector<32x128xf32>
    %36 = tpu.matmul %33, %35, %cst_14 {dimension_numbers = #tpu.dot_dimension_numbers<[1], [0], [0], [1], [0, 0, 1, 1], [], []>} : vector<32x128xbf16>, vector<128x128xbf16>, vector<32x128xf32> -> vector<32x128xf32>
    %37 = arith.addf %32, %36 : vector<32x128xf32>
    %c31_i32 = arith.constant 31 : i32
    %38 = tpu.dynamic_rotate %6 by %c31_i32 dim 0 : vector<32x128xf32>, i32 -> vector<32x128xf32>
    %39 = tpu.iota {dimensions = array<i32: 0>} : vector<32x128xi32>
    %c16_i32_15 = arith.constant 16 : i32
    %c0_i32_16 = arith.constant 0 : i32
    %40 = arith.cmpi eq, %c16_i32_15, %c0_i32_16 : i32
    %c1_i32_17 = arith.constant 1 : i32
    %41 = arith.select %40, %c1_i32_17, %c16_i32_15 : i32
    %42 = vector.broadcast %41 : i32 to vector<32x128xi32>
    %43 = arith.remsi %39, %42 : vector<32x128xi32>
    %c0_i32_18 = arith.constant 0 : i32
    %44 = vector.broadcast %c0_i32_18 : i32 to vector<32x128xi32>
    %45 = arith.cmpi ne, %43, %44 : vector<32x128xi32>
    %c0_i32_19 = arith.constant 0 : i32
    %46 = vector.broadcast %c0_i32_19 : i32 to vector<32x128xi32>
    %47 = arith.cmpi slt, %43, %46 : vector<32x128xi32>
    %c0_i32_20 = arith.constant 0 : i32
    %48 = arith.cmpi slt, %41, %c0_i32_20 : i32
    %49 = vector.broadcast %48 : i1 to vector<32x128xi1>
    %50 = vector.broadcast %49 : vector<32x128xi1> to vector<32x128xi1>
    %51 = arith.xori %47, %50 : vector<32x128xi1>
    %52 = arith.andi %51, %45 : vector<32x128xi1>
    %53 = vector.broadcast %41 : i32 to vector<32x128xi32>
    %54 = arith.addi %43, %53 : vector<32x128xi32>
    %55 = arith.select %52, %54, %43 : vector<32x128xi1>, vector<32x128xi32>
    %c15_i32 = arith.constant 15 : i32
    %56 = vector.broadcast %c15_i32 : i32 to vector<32x128xi32>
    %57 = arith.cmpi slt, %55, %56 : vector<32x128xi32>
    %cst_21 = arith.constant 0.000000e+00 : f32
    %58 = vector.broadcast %cst_21 : f32 to vector<32x128xf32>
    %59 = arith.select %57, %38, %58 : vector<32x128xi1>, vector<32x128xf32>
    %60 = arith.truncf %59 : vector<32x128xf32> to vector<32x128xbf16>
    %c2 = arith.constant 2 : index
    %c0_22 = arith.constant 0 : index
    %c0_23 = arith.constant 0 : index
    %61 = vector.load %arg4[%c2, %c0_22, %c0_23] : memref<3x128x128xbf16, #tpu.memory_space<vmem>>, vector<1x128x128xbf16>
    %62 = vector.shape_cast %61 : vector<1x128x128xbf16> to vector<128x128xbf16>
    %cst_24 = arith.constant dense<0.000000e+00> : vector<32x128xf32>
    %63 = tpu.matmul %60, %62, %cst_24 {dimension_numbers = #tpu.dot_dimension_numbers<[1], [0], [0], [1], [0, 0, 1, 1], [], []>} : vector<32x128xbf16>, vector<128x128xbf16>, vector<32x128xf32> -> vector<32x128xf32>
    %64 = arith.addf %37, %63 : vector<32x128xf32>
    %cst_25 = arith.constant dense<0.000000e+00> : vector<128xf32>
    %65 = vector.multi_reduction <add>, %64, %cst_25 [0] : vector<32x128xf32> to vector<128xf32>
    %66 = vector.shape_cast %65 : vector<128xf32> to vector<1x128xf32>
    %cst_26 = arith.constant dense<0.000000e+00> : vector<1x8xf32>
    %67 = tpu.matmul %66, %1, %cst_26 {dimension_numbers = #tpu.dot_dimension_numbers<[1], [1], [0], [0], [0, 0, 1, 0], [], []>} : vector<1x128xf32>, vector<8x128xf32>, vector<1x8xf32> -> vector<1x8xf32>
    %cst_27 = arith.constant 0.001953125 : f32
    %68 = vector.broadcast %cst_27 : f32 to vector<1x8xf32>
    %69 = arith.mulf %67, %68 : vector<1x8xf32>
    %cst_28 = arith.constant dense<0.000000e+00> : vector<1x128xf32>
    %70 = tpu.matmul %69, %1, %cst_28 {dimension_numbers = #tpu.dot_dimension_numbers<[1], [0], [0], [1], [0, 0, 1, 1], [], []>} : vector<1x8xf32>, vector<8x128xf32>, vector<1x128xf32> -> vector<1x128xf32>
    %71 = vector.broadcast %70 : vector<1x128xf32> to vector<32x128xf32>
    %72 = arith.subf %64, %71 : vector<32x128xf32>
    %73 = arith.mulf %72, %72 : vector<32x128xf32>
    %cst_29 = arith.constant dense<0.000000e+00> : vector<128xf32>
    %74 = vector.multi_reduction <add>, %73, %cst_29 [0] : vector<32x128xf32> to vector<128xf32>
    %75 = vector.shape_cast %74 : vector<128xf32> to vector<1x128xf32>
    %cst_30 = arith.constant dense<0.000000e+00> : vector<1x8xf32>
    %76 = tpu.matmul %75, %1, %cst_30 {dimension_numbers = #tpu.dot_dimension_numbers<[1], [1], [0], [0], [0, 0, 1, 0], [], []>} : vector<1x128xf32>, vector<8x128xf32>, vector<1x8xf32> -> vector<1x8xf32>
    %cst_31 = arith.constant 0.001953125 : f32
    %77 = vector.broadcast %cst_31 : f32 to vector<1x8xf32>
    %78 = arith.mulf %76, %77 : vector<1x8xf32>
    %cst_32 = arith.constant 9.99999974E-6 : f32
    %79 = vector.broadcast %cst_32 : f32 to vector<1x8xf32>
    %80 = arith.addf %78, %79 : vector<1x8xf32>
    %81 = math.rsqrt %80 : vector<1x8xf32>
    %82 = arith.mulf %2, %81 : vector<1x8xf32>
    %cst_33 = arith.constant dense<0.000000e+00> : vector<1x128xf32>
    %83 = tpu.matmul %82, %1, %cst_33 {dimension_numbers = #tpu.dot_dimension_numbers<[1], [0], [0], [1], [0, 0, 1, 1], [], []>} : vector<1x8xf32>, vector<8x128xf32>, vector<1x128xf32> -> vector<1x128xf32>
    %cst_34 = arith.constant dense<0.000000e+00> : vector<1x128xf32>
    %84 = tpu.matmul %3, %1, %cst_34 {dimension_numbers = #tpu.dot_dimension_numbers<[1], [0], [0], [1], [0, 0, 1, 1], [], []>} : vector<1x8xf32>, vector<8x128xf32>, vector<1x128xf32> -> vector<1x128xf32>
    %85 = vector.broadcast %83 : vector<1x128xf32> to vector<32x128xf32>
    %86 = arith.mulf %72, %85 : vector<32x128xf32>
    %87 = vector.broadcast %84 : vector<1x128xf32> to vector<32x128xf32>
    %88 = arith.addf %86, %87 : vector<32x128xf32>
    %cst_35 = arith.constant 0.000000e+00 : f32
    %89 = vector.broadcast %cst_35 : f32 to vector<32x128xf32>
    %90 = arith.maximumf %88, %89 : vector<32x128xf32>
    %c0_36 = arith.constant 0 : index
    %c0_37 = arith.constant 0 : index
    %91 = vector.load %arg1[%c0_36, %c0_37] : memref<2x32xbf16, #tpu.memory_space<vmem>>, vector<2x32xbf16>
    %c0_38 = arith.constant 0 : index
    %c0_39 = arith.constant 0 : index
    %92 = vector.load %arg2[%c0_38, %c0_39] : memref<32x8xbf16, #tpu.memory_space<vmem>>, vector<32x8xbf16>
    %cst_40 = arith.constant dense<0.000000e+00> : vector<2x8xf32>
    %93 = tpu.matmul %91, %92, %cst_40 {dimension_numbers = #tpu.dot_dimension_numbers<[1], [0], [0], [1], [0, 0, 1, 1], [], []>} : vector<2x32xbf16>, vector<32x8xbf16>, vector<2x8xf32> -> vector<2x8xf32>
    %94 = vector.broadcast %4 : vector<1x8xf32> to vector<2x8xf32>
    %95 = arith.addf %93, %94 : vector<2x8xf32>
    %cst_41 = arith.constant 0.000000e+00 : f32
    %96 = vector.broadcast %cst_41 : f32 to vector<2x8xf32>
    %97 = arith.maximumf %95, %96 : vector<2x8xf32>
    %cst_42 = arith.constant dense<0.000000e+00> : vector<2x128xf32>
    %98 = tpu.matmul %97, %1, %cst_42 {dimension_numbers = #tpu.dot_dimension_numbers<[1], [0], [0], [1], [0, 0, 1, 1], [], []>} : vector<2x8xf32>, vector<8x128xf32>, vector<2x128xf32> -> vector<2x128xf32>
    %c0_43 = arith.constant 0 : index
    %c0_44 = arith.constant 0 : index
    %99 = vector.load %arg8[%c0_43, %c0_44] : memref<32x2xf32, #tpu.memory_space<vmem>>, vector<32x2xf32>
    %cst_45 = arith.constant dense<0.000000e+00> : vector<32x128xf32>
    %100 = tpu.matmul %99, %98, %cst_45 {dimension_numbers = #tpu.dot_dimension_numbers<[1], [0], [0], [1], [0, 0, 1, 1], [], []>} : vector<32x2xf32>, vector<2x128xf32>, vector<32x128xf32> -> vector<32x128xf32>
    %101 = arith.addf %90, %100 : vector<32x128xf32>
    %c1_i32_46 = arith.constant 1 : i32
    %102 = tpu.dynamic_rotate %101 by %c1_i32_46 dim 0 : vector<32x128xf32>, i32 -> vector<32x128xf32>
    %103 = tpu.iota {dimensions = array<i32: 0>} : vector<32x128xi32>
    %c16_i32_47 = arith.constant 16 : i32
    %c0_i32_48 = arith.constant 0 : i32
    %104 = arith.cmpi eq, %c16_i32_47, %c0_i32_48 : i32
    %c1_i32_49 = arith.constant 1 : i32
    %105 = arith.select %104, %c1_i32_49, %c16_i32_47 : i32
    %106 = vector.broadcast %105 : i32 to vector<32x128xi32>
    %107 = arith.remsi %103, %106 : vector<32x128xi32>
    %c0_i32_50 = arith.constant 0 : i32
    %108 = vector.broadcast %c0_i32_50 : i32 to vector<32x128xi32>
    %109 = arith.cmpi ne, %107, %108 : vector<32x128xi32>
    %c0_i32_51 = arith.constant 0 : i32
    %110 = vector.broadcast %c0_i32_51 : i32 to vector<32x128xi32>
    %111 = arith.cmpi slt, %107, %110 : vector<32x128xi32>
    %c0_i32_52 = arith.constant 0 : i32
    %112 = arith.cmpi slt, %105, %c0_i32_52 : i32
    %113 = vector.broadcast %112 : i1 to vector<32x128xi1>
    %114 = vector.broadcast %113 : vector<32x128xi1> to vector<32x128xi1>
    %115 = arith.xori %111, %114 : vector<32x128xi1>
    %116 = arith.andi %115, %109 : vector<32x128xi1>
    %117 = vector.broadcast %105 : i32 to vector<32x128xi32>
    %118 = arith.addi %107, %117 : vector<32x128xi32>
    %119 = arith.select %116, %118, %107 : vector<32x128xi1>, vector<32x128xi32>
    %c1_i32_53 = arith.constant 1 : i32
    %120 = vector.broadcast %c1_i32_53 : i32 to vector<32x128xi32>
    %121 = arith.cmpi sge, %119, %120 : vector<32x128xi32>
    %cst_54 = arith.constant 0.000000e+00 : f32
    %122 = vector.broadcast %cst_54 : f32 to vector<32x128xf32>
    %123 = arith.select %121, %102, %122 : vector<32x128xi1>, vector<32x128xf32>
    %124 = arith.truncf %123 : vector<32x128xf32> to vector<32x128xbf16>
    %c0_55 = arith.constant 0 : index
    %c0_56 = arith.constant 0 : index
    %c0_57 = arith.constant 0 : index
    %125 = vector.load %arg5[%c0_55, %c0_56, %c0_57] : memref<3x128x128xbf16, #tpu.memory_space<vmem>>, vector<1x128x128xbf16>
    %126 = vector.shape_cast %125 : vector<1x128x128xbf16> to vector<128x128xbf16>
    %cst_58 = arith.constant dense<0.000000e+00> : vector<32x128xf32>
    %127 = tpu.matmul %124, %126, %cst_58 {dimension_numbers = #tpu.dot_dimension_numbers<[1], [0], [0], [1], [0, 0, 1, 1], [], []>} : vector<32x128xbf16>, vector<128x128xbf16>, vector<32x128xf32> -> vector<32x128xf32>
    %128 = arith.truncf %101 : vector<32x128xf32> to vector<32x128xbf16>
    %c1_59 = arith.constant 1 : index
    %c0_60 = arith.constant 0 : index
    %c0_61 = arith.constant 0 : index
    %129 = vector.load %arg5[%c1_59, %c0_60, %c0_61] : memref<3x128x128xbf16, #tpu.memory_space<vmem>>, vector<1x128x128xbf16>
    %130 = vector.shape_cast %129 : vector<1x128x128xbf16> to vector<128x128xbf16>
    %cst_62 = arith.constant dense<0.000000e+00> : vector<32x128xf32>
    %131 = tpu.matmul %128, %130, %cst_62 {dimension_numbers = #tpu.dot_dimension_numbers<[1], [0], [0], [1], [0, 0, 1, 1], [], []>} : vector<32x128xbf16>, vector<128x128xbf16>, vector<32x128xf32> -> vector<32x128xf32>
    %132 = arith.addf %127, %131 : vector<32x128xf32>
    %c31_i32_63 = arith.constant 31 : i32
    %133 = tpu.dynamic_rotate %101 by %c31_i32_63 dim 0 : vector<32x128xf32>, i32 -> vector<32x128xf32>
    %134 = tpu.iota {dimensions = array<i32: 0>} : vector<32x128xi32>
    %c16_i32_64 = arith.constant 16 : i32
    %c0_i32_65 = arith.constant 0 : i32
    %135 = arith.cmpi eq, %c16_i32_64, %c0_i32_65 : i32
    %c1_i32_66 = arith.constant 1 : i32
    %136 = arith.select %135, %c1_i32_66, %c16_i32_64 : i32
    %137 = vector.broadcast %136 : i32 to vector<32x128xi32>
    %138 = arith.remsi %134, %137 : vector<32x128xi32>
    %c0_i32_67 = arith.constant 0 : i32
    %139 = vector.broadcast %c0_i32_67 : i32 to vector<32x128xi32>
    %140 = arith.cmpi ne, %138, %139 : vector<32x128xi32>
    %c0_i32_68 = arith.constant 0 : i32
    %141 = vector.broadcast %c0_i32_68 : i32 to vector<32x128xi32>
    %142 = arith.cmpi slt, %138, %141 : vector<32x128xi32>
    %c0_i32_69 = arith.constant 0 : i32
    %143 = arith.cmpi slt, %136, %c0_i32_69 : i32
    %144 = vector.broadcast %143 : i1 to vector<32x128xi1>
    %145 = vector.broadcast %144 : vector<32x128xi1> to vector<32x128xi1>
    %146 = arith.xori %142, %145 : vector<32x128xi1>
    %147 = arith.andi %146, %140 : vector<32x128xi1>
    %148 = vector.broadcast %136 : i32 to vector<32x128xi32>
    %149 = arith.addi %138, %148 : vector<32x128xi32>
    %150 = arith.select %147, %149, %138 : vector<32x128xi1>, vector<32x128xi32>
    %c15_i32_70 = arith.constant 15 : i32
    %151 = vector.broadcast %c15_i32_70 : i32 to vector<32x128xi32>
    %152 = arith.cmpi slt, %150, %151 : vector<32x128xi32>
    %cst_71 = arith.constant 0.000000e+00 : f32
    %153 = vector.broadcast %cst_71 : f32 to vector<32x128xf32>
    %154 = arith.select %152, %133, %153 : vector<32x128xi1>, vector<32x128xf32>
    %155 = arith.truncf %154 : vector<32x128xf32> to vector<32x128xbf16>
    %c2_72 = arith.constant 2 : index
    %c0_73 = arith.constant 0 : index
    %c0_74 = arith.constant 0 : index
    %156 = vector.load %arg5[%c2_72, %c0_73, %c0_74] : memref<3x128x128xbf16, #tpu.memory_space<vmem>>, vector<1x128x128xbf16>
    %157 = vector.shape_cast %156 : vector<1x128x128xbf16> to vector<128x128xbf16>
    %cst_75 = arith.constant dense<0.000000e+00> : vector<32x128xf32>
    %158 = tpu.matmul %155, %157, %cst_75 {dimension_numbers = #tpu.dot_dimension_numbers<[1], [0], [0], [1], [0, 0, 1, 1], [], []>} : vector<32x128xbf16>, vector<128x128xbf16>, vector<32x128xf32> -> vector<32x128xf32>
    %159 = arith.addf %132, %158 : vector<32x128xf32>
    %cst_76 = arith.constant dense<0.000000e+00> : vector<128xf32>
    %160 = vector.multi_reduction <add>, %159, %cst_76 [0] : vector<32x128xf32> to vector<128xf32>
    %161 = vector.shape_cast %160 : vector<128xf32> to vector<1x128xf32>
    %cst_77 = arith.constant dense<0.000000e+00> : vector<1x8xf32>
    %162 = tpu.matmul %161, %1, %cst_77 {dimension_numbers = #tpu.dot_dimension_numbers<[1], [1], [0], [0], [0, 0, 1, 0], [], []>} : vector<1x128xf32>, vector<8x128xf32>, vector<1x8xf32> -> vector<1x8xf32>
    %cst_78 = arith.constant 0.001953125 : f32
    %163 = vector.broadcast %cst_78 : f32 to vector<1x8xf32>
    %164 = arith.mulf %162, %163 : vector<1x8xf32>
    %cst_79 = arith.constant dense<0.000000e+00> : vector<1x128xf32>
    %165 = tpu.matmul %164, %1, %cst_79 {dimension_numbers = #tpu.dot_dimension_numbers<[1], [0], [0], [1], [0, 0, 1, 1], [], []>} : vector<1x8xf32>, vector<8x128xf32>, vector<1x128xf32> -> vector<1x128xf32>
    %166 = vector.broadcast %165 : vector<1x128xf32> to vector<32x128xf32>
    %167 = arith.subf %159, %166 : vector<32x128xf32>
    %168 = arith.mulf %167, %167 : vector<32x128xf32>
    %cst_80 = arith.constant dense<0.000000e+00> : vector<128xf32>
    %169 = vector.multi_reduction <add>, %168, %cst_80 [0] : vector<32x128xf32> to vector<128xf32>
    %170 = vector.shape_cast %169 : vector<128xf32> to vector<1x128xf32>
    %cst_81 = arith.constant dense<0.000000e+00> : vector<1x8xf32>
    %171 = tpu.matmul %170, %1, %cst_81 {dimension_numbers = #tpu.dot_dimension_numbers<[1], [1], [0], [0], [0, 0, 1, 0], [], []>} : vector<1x128xf32>, vector<8x128xf32>, vector<1x8xf32> -> vector<1x8xf32>
    %cst_82 = arith.constant 0.001953125 : f32
    %172 = vector.broadcast %cst_82 : f32 to vector<1x8xf32>
    %173 = arith.mulf %171, %172 : vector<1x8xf32>
    %cst_83 = arith.constant 9.99999974E-6 : f32
    %174 = vector.broadcast %cst_83 : f32 to vector<1x8xf32>
    %175 = arith.addf %173, %174 : vector<1x8xf32>
    %176 = math.rsqrt %175 : vector<1x8xf32>
    %177 = arith.mulf %2, %176 : vector<1x8xf32>
    %cst_84 = arith.constant dense<0.000000e+00> : vector<1x128xf32>
    %178 = tpu.matmul %177, %1, %cst_84 {dimension_numbers = #tpu.dot_dimension_numbers<[1], [0], [0], [1], [0, 0, 1, 1], [], []>} : vector<1x8xf32>, vector<8x128xf32>, vector<1x128xf32> -> vector<1x128xf32>
    %cst_85 = arith.constant dense<0.000000e+00> : vector<1x128xf32>
    %179 = tpu.matmul %3, %1, %cst_85 {dimension_numbers = #tpu.dot_dimension_numbers<[1], [0], [0], [1], [0, 0, 1, 1], [], []>} : vector<1x8xf32>, vector<8x128xf32>, vector<1x128xf32> -> vector<1x128xf32>
    %180 = vector.broadcast %178 : vector<1x128xf32> to vector<32x128xf32>
    %181 = arith.mulf %167, %180 : vector<32x128xf32>
    %182 = vector.broadcast %179 : vector<1x128xf32> to vector<32x128xf32>
    %183 = arith.addf %181, %182 : vector<32x128xf32>
    %cst_86 = arith.constant 0.000000e+00 : f32
    %184 = vector.broadcast %cst_86 : f32 to vector<32x128xf32>
    %185 = arith.maximumf %183, %184 : vector<32x128xf32>
    %c0_87 = arith.constant 0 : index
    %c0_88 = arith.constant 0 : index
    %186 = vector.load %arg3[%c0_87, %c0_88] : memref<64x32xbf16, #tpu.memory_space<vmem>>, vector<64x32xbf16>
    %187 = arith.truncf %185 : vector<32x128xf32> to vector<32x128xbf16>
    %cst_89 = arith.constant dense<0.000000e+00> : vector<64x128xf32>
    %188 = tpu.matmul %186, %187, %cst_89 {dimension_numbers = #tpu.dot_dimension_numbers<[1], [0], [0], [1], [0, 0, 1, 1], [], []>} : vector<64x32xbf16>, vector<32x128xbf16>, vector<64x128xf32> -> vector<64x128xf32>
    %189 = arith.truncf %188 : vector<64x128xf32> to vector<64x128xbf16>
    %190 = vector.extract_strided_slice %189 {offsets = [0, 0], sizes = [16, 128], strides = [1, 1]} : vector<64x128xbf16> to vector<16x128xbf16>
    %c0_90 = arith.constant 0 : index
    %c0_91 = arith.constant 0 : index
    %c0_92 = arith.constant 0 : index
    %191 = vector.load %arg6[%c0_90, %c0_91, %c0_92] : memref<4x128x128xbf16, #tpu.memory_space<vmem>>, vector<1x128x128xbf16>
    %192 = vector.shape_cast %191 : vector<1x128x128xbf16> to vector<128x128xbf16>
    %cst_93 = arith.constant dense<0.000000e+00> : vector<16x128xf32>
    %193 = tpu.matmul %190, %192, %cst_93 {dimension_numbers = #tpu.dot_dimension_numbers<[1], [0], [0], [1], [0, 0, 1, 1], [], []>} : vector<16x128xbf16>, vector<128x128xbf16>, vector<16x128xf32> -> vector<16x128xf32>
    %194 = vector.extract_strided_slice %189 {offsets = [16, 0], sizes = [16, 128], strides = [1, 1]} : vector<64x128xbf16> to vector<16x128xbf16>
    %c1_94 = arith.constant 1 : index
    %c0_95 = arith.constant 0 : index
    %c0_96 = arith.constant 0 : index
    %195 = vector.load %arg6[%c1_94, %c0_95, %c0_96] : memref<4x128x128xbf16, #tpu.memory_space<vmem>>, vector<1x128x128xbf16>
    %196 = vector.shape_cast %195 : vector<1x128x128xbf16> to vector<128x128xbf16>
    %cst_97 = arith.constant dense<0.000000e+00> : vector<16x128xf32>
    %197 = tpu.matmul %194, %196, %cst_97 {dimension_numbers = #tpu.dot_dimension_numbers<[1], [0], [0], [1], [0, 0, 1, 1], [], []>} : vector<16x128xbf16>, vector<128x128xbf16>, vector<16x128xf32> -> vector<16x128xf32>
    %198 = arith.addf %193, %197 : vector<16x128xf32>
    %199 = vector.extract_strided_slice %189 {offsets = [32, 0], sizes = [16, 128], strides = [1, 1]} : vector<64x128xbf16> to vector<16x128xbf16>
    %c2_98 = arith.constant 2 : index
    %c0_99 = arith.constant 0 : index
    %c0_100 = arith.constant 0 : index
    %200 = vector.load %arg6[%c2_98, %c0_99, %c0_100] : memref<4x128x128xbf16, #tpu.memory_space<vmem>>, vector<1x128x128xbf16>
    %201 = vector.shape_cast %200 : vector<1x128x128xbf16> to vector<128x128xbf16>
    %cst_101 = arith.constant dense<0.000000e+00> : vector<16x128xf32>
    %202 = tpu.matmul %199, %201, %cst_101 {dimension_numbers = #tpu.dot_dimension_numbers<[1], [0], [0], [1], [0, 0, 1, 1], [], []>} : vector<16x128xbf16>, vector<128x128xbf16>, vector<16x128xf32> -> vector<16x128xf32>
    %203 = arith.addf %198, %202 : vector<16x128xf32>
    %204 = vector.extract_strided_slice %189 {offsets = [48, 0], sizes = [16, 128], strides = [1, 1]} : vector<64x128xbf16> to vector<16x128xbf16>
    %c3 = arith.constant 3 : index
    %c0_102 = arith.constant 0 : index
    %c0_103 = arith.constant 0 : index
    %205 = vector.load %arg6[%c3, %c0_102, %c0_103] : memref<4x128x128xbf16, #tpu.memory_space<vmem>>, vector<1x128x128xbf16>
    %206 = vector.shape_cast %205 : vector<1x128x128xbf16> to vector<128x128xbf16>
    %cst_104 = arith.constant dense<0.000000e+00> : vector<16x128xf32>
    %207 = tpu.matmul %204, %206, %cst_104 {dimension_numbers = #tpu.dot_dimension_numbers<[1], [0], [0], [1], [0, 0, 1, 1], [], []>} : vector<16x128xbf16>, vector<128x128xbf16>, vector<16x128xf32> -> vector<16x128xf32>
    %208 = arith.addf %203, %207 : vector<16x128xf32>
    %209 = vector.broadcast %5 : vector<1x128xf32> to vector<16x128xf32>
    %210 = arith.addf %208, %209 : vector<16x128xf32>
    %c0_105 = arith.constant 0 : index
    %c0_106 = arith.constant 0 : index
    %211 = vector.load %arg9[%c0_105, %c0_106] : memref<16x128xf32, #tpu.memory_space<vmem>>, vector<16x128xf32>
    tpu.vector_store %arg9[%c0_105, %c0_106], %210 {strides = array<i32>} : memref<16x128xf32, #tpu.memory_space<vmem>>, vector<16x128xf32>,
    return
  }
}

</mosaic_0001>

<bundles_post_ra>
// kernel: tpu_custom_call.1
= control target key start
LH: loop header
LB: loop body
LE: loop exit
PB: predicated region body
PF: predicated region fallthrough
CT: control target
= control target key end

     0   :  { %14 = vsyncpa [#allocation3], 0  ;;  %s2439_s0 = inlined_call_operand.vmem [shape: f32[32,128], index: 0, kind: input, shape index: {}]   ;;  %s2440_s1 = inlined_call_operand.vmem [shape: bf16[2,32], index: 1, kind: input, shape index: {}]   ;;  %s2441_s2 = inlined_call_operand.vmem [shape: bf16[32,8], index: 2, kind: input, shape index: {}]   ;;  %s2442_s3 = inlined_call_operand.vmem [shape: bf16[64,32], index: 3, kind: input, shape index: {}]   ;;  %s2443_s4 = inlined_call_operand.hbm [shape: bf16[3,128,128], index: 4, kind: input, shape index: {}]   ;;  %s2444_s5 = inlined_call_operand.hbm [shape: bf16[3,128,128], index: 5, kind: input, shape index: {}]   ;;  %s2445_s6 = inlined_call_operand.hbm [shape: bf16[4,128,128], index: 6, kind: input, shape index: {}]   ;;  %s2446_s7 = inlined_call_operand.vmem [shape: f32[16,128], index: 7, kind: input, shape index: {}]   ;;  %s2447_s8 = inlined_call_operand.vmem [shape: f32[32,2], index: 8, kind: input, shape index: {}]   ;;  %s2448_s9 = inlined_call_operand.hbm [shape: f32[16,128], index: 9, kind: output, shape index: {}]  }
   0x1   :  { %15 = vsyncpa [#allocation6], 0 }
   0x2   :  { %16 = vsyncpa [#allocation4], 0  ;;  %s42_s11 = sshll.u32 %s2444_s5, 4  ;;  %s2171_s12 = smov [#allocation5]   ;;  %s43_s11 = int_to_ptr.hbm [resolvable:$true] %s42_s11 }
   0x3   :  { %s44_s13 = sshll.u32 %s2171_s12, 4  ;;  %s29_s16 = sshll.u32 %s2443_s4, 4  ;;  %s45_s13 = int_to_ptr.vmem [resolvable:$true] %s44_s13  ;;  %s30_s16 = int_to_ptr.hbm [resolvable:$true] %s29_s16 }
   0x4   :  { %s2172_s17 = smov 64   ;;  %s2173_s18 = smov 4  }
   0x5   :  { %50 = dma.hbm_to_vmem [thread:$0]  %s43_s11, 3072, %s45_s13, [#allocation6], %s2172_s17, %s2172_s17, %s2173_s18  }
   0x6   :  { %s2174_s19 = smov [#allocation2]   ;;  %s55_s23 = sshll.u32 %s2445_s6, 4  ;;  %s56_s23 = int_to_ptr.hbm [resolvable:$true] %s55_s23 }
   0x7   :  { %s31_s20 = sshll.u32 %s2174_s19, 4  ;;  %s2175_s5 = smov [#allocation7]   ;;  %s32_s20 = int_to_ptr.vmem [resolvable:$true] %s31_s20 }
   0x8   :  { %37 = dma.hbm_to_vmem [thread:$0]  %s30_s16, 3072, %s32_s20, [#allocation3], %s2172_s17, %s2172_s17, %s2173_s18  }
   0x9   :  { %s57_s24 = sshll.u32 %s2175_s5, 4  ;;  %s58_s24 = int_to_ptr.vmem [resolvable:$true] %s57_s24 }
   0xa   :  { %63 = dma.hbm_to_vmem [thread:$0]  %s56_s23, 4096, %s58_s24, [#allocation6], %s2172_s17, %s2172_s17, %s2173_s18  }
   0xb   :  { %2165 = dma.done.wait [#allocation3], 3072  }
   0xc   :  { %2166 = vsyncadd [#allocation3], 4294964224 }
   0xd   :  { %2167 = dma.done.wait [#allocation6], 7168  }
   0xe   :  { %2168 = vsyncadd [#allocation6], 4294960128  ;;  %v1985_v0 = vld [vmem:[#allocation2 + $0x78] sm:$0xff]  ;;  %v1984_v3 = vld [vmem:[#allocation2 + $0x70] sm:$0xff]  ;;  %v91_v12 = vlaneseq  ;;  %vm2176_vm4 = vmmov 1   ;;  %vm465_vm11 = vcmask 64512  }
   0xf   :  { %v1977_v1 = vld [vmem:[#allocation2 + $0x38] sm:$0xff]  ;;  %242 = vmatpush.bf16.msra.mxu0 %v1985_v0  ;;  %v1976_v4 = vld [vmem:[#allocation2 + $0x30] sm:$0xff]  ;;  %v1983_v6 = vld [vmem:[#allocation2 + $0x68] sm:$0xff]  ;;  %vm619_vm15 = vcmask 261120   ;;  %s2178_s10 = smov 128   ;;  %s2179_s11 = smov 8  }
  0x10   :  { %v1993_v2 = vld [vmem:[#allocation2 + $0xb8] sm:$0xff]  ;;  %309 = vmatpush.bf16.msra.mxu1 %v1977_v1  ;;  %v1992_v5 = vld [vmem:[#allocation2 + $0xb0] sm:$0xff]  ;;  %v1975_v7 = vld [vmem:[#allocation2 + $0x28] sm:$0xff]  ;;  %v2239_v16 = vshrl.u32 %v91_v12, 7 }
  0x11   :  { %412 = vmatpush.bf16.msra.mxu2 %v1993_v2  ;;  %v1991_v8 = vld [vmem:[#allocation2 + $0xa8] sm:$0xff]  ;;  %v1982_v9 = vld [vmem:[#allocation2 + $0x60] sm:$0xff]  ;;  %v1981_v13 = vld [vmem:[#allocation2 + $0x58] sm:$0xff] }
  0x12   :  { %v1974_v10 = vld [vmem:[#allocation2 + $0x20] sm:$0xff]  ;;  %v1973_v14 = vld [vmem:[#allocation2 + $0x18] sm:$0xff]  ;;  %v1980_v17 = vld [vmem:[#allocation2 + $0x50] sm:$0xff]  ;;  %v98_v24 = vadd.s32 8, %v2239_v16  ;;  %vm93_vm0 = vcmp.lt.s32.totalorder %v2239_v16, 1  ;;  %v105_v33 = vand.u32 15, %v2239_v16 }
  0x13   :  { %243 = vmatpush.bf16.msra.mxu0 %v1984_v3  ;;  %v1990_v11 = vld [vmem:[#allocation2 + $0xa0] sm:$0xff]  ;;  %v1989_v15 = vld [vmem:[#allocation2 + $0x98] sm:$0xff]  ;;  %v1972_v18 = vld [vmem:[#allocation2 + $0x10] sm:$0xff]  ;;  %vm332_vm1 = vcmp.lt.s32.totalorder %v2239_v16, 7  ;;  %v99_v48 = vadd.s32 16, %v2239_v16  ;;  %v100_v49 = vadd.s32 24, %v2239_v16 }
  0x14   :  { %310 = vmatpush.bf16.msra.mxu1 %v1976_v4  ;;  %v1988_v19 = vld [vmem:[#allocation2 + $0x90] sm:$0xff]  ;;  %v83_v20 = vld [vmem:[%s2439_s0] sm:$0xff]  ;;  %v84_v21 = vld [vmem:[%s2439_s0 + $0x8] sm:$0xff]  ;;  %v112_v35 = vand.u32 15, %v98_v24  ;;  %vm149_vm2 = vcmp.ge.s32.totalorder %v105_v33, 1 }
  0x15   :  { %413 = vmatpush.bf16.msra.mxu2 %v1992_v5  ;;  %v86_v22 = vld [vmem:[%s2439_s0 + $0x18] sm:$0xff]  ;;  %v85_v23 = vld [vmem:[%s2439_s0 + $0x10] sm:$0xff]  ;;  %v1979_v25 = vld [vmem:[#allocation2 + $0x48] sm:$0xff]  ;;  %v87_v27 = vrot.slane %v83_v20, 7  ;;  %v88_v28 = vrot.slane %v84_v21, 7  ;;  %v328_v31 = vrot.slane %v83_v20, 1  ;;  %v175_v43 = vpack.c.bf16 %v84_v21, %v83_v20 }
  0x16   :  { %v1971_v26 = vld [vmem:[#allocation2 + $0x8] sm:$0xff]  ;;  %v90_v29 = vrot.slane %v86_v22, 7  ;;  %v329_v32 = vrot.slane %v84_v21, 1  ;;  %v330_v34 = vrot.slane %v85_v23, 1  ;;  %v1978_v36 = vld [vmem:[#allocation2 + $0x40] sm:$0xff]  ;;  %vm338_vm3 = vcmp.lt.s32.totalorder %v112_v35, 15  ;;  %vm2266_vm5 = vmpackc.low %vm2176_vm4, %vm149_vm2 }
  0x17   :  { %244 = vmatpush.bf16.msra.mxu0 %v1983_v6  ;;  %v1987_v30 = vld [vmem:[#allocation2 + $0x88] sm:$0xff]  ;;  %v1970_v37 = vld [vmem:[#allocation2] sm:$0xff]  ;;  %v96_v38 = vsel %vm93_vm0, %v87_v27, %v88_v28  ;;  %vm2271_vm6 = vmpackc.low %vm338_vm3, %vm2176_vm4  ;;  %v89_v50 = vrot.slane %v85_v23, 7  ;;  %v119_v51 = vand.u32 15, %v99_v48  ;;  %v331_v52 = vrot.slane %v86_v22, 1  ;;  %s1572_s0 = sshll.u32 %s2448_s9, 4  ;;  %s1573_s0 = int_to_ptr.hbm [resolvable:$true] %s1572_s0 }
  0x18   :  { %311 = vmatpush.bf16.msra.mxu1 %v1975_v7  ;;  %v97_v39 = vsel %vm93_vm0, %v90_v29, %v87_v27  ;;  %v1986_v40 = vld [vmem:[#allocation2 + $0x80] sm:$0xff]  ;;  %v334_v41 = vsel %vm332_vm1, %v329_v32, %v330_v34  ;;  %v335_v42 = vsel %vm332_vm1, %v328_v31, %v329_v32  ;;  %v126_v53 = vand.u32 15, %v100_v49 }
  0x19   :  { %414 = vmatpush.bf16.msra.mxu2 %v1991_v8  ;;  %v1651_v44 = vpack.c.bf16 %v96_v38, %v97_v39  ;;  %v1689_v46 = vpack.c.bf16 %v334_v41, %v335_v42  ;;  %v94_v54 = vsel %vm93_vm0, %v89_v50, %v90_v29  ;;  %v95_v55 = vsel %vm93_vm0, %v88_v28, %v89_v50  ;;  %v2306_v1 = vld [vmem:[%s2446_s7] sm:$0xff] }
  0x1a   :  { %vm151_vm7 = vcmp.ge.s32.totalorder %v119_v51, 1  ;;  %v333_v56 = vsel %vm332_vm1, %v330_v34, %v331_v52  ;;  %v336_v57 = vsel %vm332_vm1, %v331_v52, %v328_v31  ;;  %vm340_vm8 = vcmp.lt.s32.totalorder %v126_v53, 15  ;;  %459 = vmatpush.xpose.msra.mxu3 %v2306_v1 }
  0x1b   :  { %245 = vmatpush.bf16.msra.mxu0 %v1982_v9  ;;  %v176_v58 = vpack.c.bf16 %v86_v22, %v85_v23  ;;  %v1654_v59 = vpack.c.bf16 %v94_v54, %v95_v55  ;;  %vm2290_vm9 = vmpackc.low %vm2176_vm4, %vm151_vm7  ;;  %v1692_v61 = vpack.c.bf16 %v336_v57, %v333_v56  ;;  %vm677_vm2 = vcmask 1041408  }
  0x1c   :  { %312 = vmatpush.bf16.msra.mxu1 %v1974_v10  ;;  %vm2295_vm10 = vmpackc.low %vm340_vm8, %vm2176_vm4  ;;  %vm664_vm3 = vcmask 15360  }
  0x1d   :  { %415 = vmatpush.bf16.msra.mxu2 %v1990_v11 }
  0x1e   :  { %484 = vmatpush.msrb.mxu3 %v2306_v1 }
  0x1f   :  { %246 = vmatpush.bf16.msra.mxu0 %v1981_v13 }
  0x20   :  { %313 = vmatpush.bf16.msra.mxu1 %v1973_v14 }
  0x21   :  { %416 = vmatpush.bf16.msra.mxu2 %v1989_v15 }
  0x23   :  { %247 = vmatpush.bf16.msra.mxu0 %v1980_v17 }
  0x24   :  { %314 = vmatpush.bf16.msra.mxu1 %v1972_v18 }
  0x25   :  { %417 = vmatpush.bf16.msra.mxu2 %v1988_v19 }
  0x27   :  { %248 = vmatpush.bf16.msra.mxu0 %v1979_v25 }
  0x28   :  { %315 = vmatpush.bf16.msra.mxu1 %v1971_v26 }
  0x29   :  { %418 = vmatpush.bf16.msra.mxu2 %v1987_v30 }
  0x2b   :  { %249 = vmatpush.bf16.msra.mxu0 %v1978_v36 }
  0x2c   :  { %316 = vmatpush.bf16.msra.mxu1 %v1970_v37 }
  0x2d   :  { %419 = vmatpush.bf16.msra.mxu2 %v1986_v40 }
  0x2e   :  { %250 = vmatmul.bf16.vlgmr.msra.gmra.mxu0 %v175_v43 }
  0x2f   :  { %1652 = vmatmul.msk.bf16.vlgmr.msra.gmra.mxu1 %vm2266_vm5, %v1651_v44 }
  0x30   :  { %1690 = vmatmul.msk.bf16.vlgmr.msra.gmra.mxu2 %vm2271_vm6, %v1689_v46 }
  0x3e   :  { %255 = vmatmul.bf16.gmra.mxu0 %v176_v58 }
  0x3f   :  { %1655 = vmatmul.msk.bf16.gmra.mxu1 %vm2290_vm9, %v1654_v59 }
  0x40   :  { %1693 = vmatmul.msk.bf16.gmra.mxu2 %vm2295_vm10, %v1692_v61 }
  0xab   :  { %v251_v63 = vpop.f32.mrf.mxu0 }
  0xac   :  { %v318_v0 = vpop.f32.mrf.mxu1 }
  0xad   :  { %v319_v9 = vadd.f32 %v318_v0, %v251_v63  ;;  %v2333_v63 = vld [vmem:[%s2446_s7 + $0x8] sm:$0xff] }
  0xb3   :  { %v421_v2 = vpop.f32.mrf.mxu2  ;;  %v253_v3 = vpop.f32.mrf.mxu0 }
  0xb4   :  { %v320_v4 = vpop.f32.mrf.mxu1  ;;  %v431_v15 = vadd.f32 %v421_v2, %v319_v9 }
  0xb5   :  { %v321_v10 = vadd.f32 %v320_v4, %v253_v3  ;;  %v1995_v3 = vld [vmem:[%s2441_s2 + $0x8] sm:$0xff] }
  0xbb   :  { %v423_v5 = vpop.f32.mrf.mxu2  ;;  %v256_v6 = vpop.f32.mrf.mxu0 }
  0xbc   :  { %v323_v7 = vpop.f32.mrf.mxu1  ;;  %v432_v12 = vadd.f32 %v423_v5, %v321_v10  ;;  %v1994_v5 = vld [vmem:[%s2441_s2] sm:$0xff]  ;;  %v606_v10 = vperm.slane %v2333_v63, 2 }
  0xbd   :  { %v324_v11 = vadd.f32 %v323_v7, %v256_v6  ;;  %v564_v6 = vrot.slane %v2333_v63, 1  ;;  %v601_v7 = vld [vmem:[%s2440_s1] sm:$0x1] }
  0xbe   :  { %v435_v18 = vadd.f32 %v432_v12, %v431_v15 }
  0xc3   :  { %v426_v8 = vpop.f32.mrf.mxu2  ;;  %v258_v13 = vpop.f32.mrf.mxu0 }
  0xc4   :  { %v325_v14 = vpop.f32.mrf.mxu1  ;;  %v433_v17 = vadd.f32 %v426_v8, %v324_v11 }
  0xc5   :  { %v326_v19 = vadd.f32 %v325_v14, %v258_v13 }
  0xc6   :  { %v436_v21 = vadd.f32 %v435_v18, %v433_v17  ;;  %v2010_v18 = vld [vmem:[#allocation5 + $0x70] sm:$0xff] }
  0xcb   :  { %v428_v20 = vpop.f32.mrf.mxu2 }
  0xcc   :  { %v434_v22 = vadd.f32 %v428_v20, %v326_v19  ;;  %v2018_v19 = vld [vmem:[#allocation5 + $0xb0] sm:$0xff]  ;;  %v660_v20 = vld [vmem:[%s2447_s8] sm:$0xff] }
  0xce   :  { %v437_v23 = vadd.f32 %v436_v21, %v434_v22 }
  0xd0   :  { %v438_v24 = vrot.slane %v437_v23, 4 }
  0xd2   :  { %v439_v25 = vadd.f32 %v438_v24, %v437_v23  ;;  %v2008_v23 = vld [vmem:[#allocation5 + $0x60] sm:$0xff]  ;;  %v661_v24 = vld [vmem:[%s2447_s8 + $0x8] sm:$0xff] }
  0xd4   :  { %v440_v26 = vrot.slane %v439_v25, 2 }
  0xd6   :  { %v441_v27 = vadd.f32 %v440_v26, %v439_v25  ;;  %v2007_v25 = vld [vmem:[#allocation5 + $0x58] sm:$0xff]  ;;  %v662_v26 = vld [vmem:[%s2447_s8 + $0x10] sm:$0xff] }
  0xd8   :  { %v442_v28 = vrot.slane %v441_v27, 1 }
  0xda   :  { %v443_v29 = vadd.f32 %v442_v28, %v441_v27  ;;  %v663_v27 = vld [vmem:[%s2447_s8 + $0x18] sm:$0xff] }
  0xdb   :  { %v2003_v28 = vld [vmem:[#allocation5 + $0x38] sm:$0xff] }
  0xdc   :  { %460 = vmatmul.f32.vlgmr.msra.gmra.mxu3 %v443_v29  ;;  %v2017_v29 = vld [vmem:[#allocation5 + $0xa8] sm:$0xff]  ;;  %878 = vmatpush.bf16.msrb.mxu2 %v2003_v28 }
  0xdd   :  { %522 = vmatpush.xpose.msra.mxu3 %v2306_v1 }
 0x15f   :  { %v461_v30 = vpop.f32.mrf.mxu3 }
 0x160   :  { %v464_v31 = vmul.f32 0.001953125, %v461_v30  ;;  %v2006_v30 = vld [vmem:[#allocation5 + $0x50] sm:$0xff] }
 0x162   :  { %1694 = vmatmul.msk.f32.vlgmr.msrb.gmra.mxu3 %vm465_vm11, %v464_v31  ;;  %v2002_v31 = vld [vmem:[#allocation5 + $0x30] sm:$0xff] }
 0x163   :  { %558 = vmatpush.msrb.mxu3 %v2306_v1  ;;  %879 = vmatpush.bf16.msrb.mxu2 %v2002_v31 }
 0x1e5   :  { %v486_v32 = vpop.f32.mrf.mxu3 }
 0x1e6   :  { %v489_v33 = vperm.slane %v486_v32, 0  ;;  %v2016_v32 = vld [vmem:[#allocation5 + $0xa0] sm:$0xff] }
 0x1e8   :  { %v2313_v34 = vsub.f32 %v431_v15, %v489_v33  ;;  %v2315_v35 = vsub.f32 %v432_v12, %v489_v33  ;;  %v2317_v36 = vsub.f32 %v433_v17, %v489_v33  ;;  %v2319_v37 = vsub.f32 %v434_v22, %v489_v33  ;;  %v2011_v15 = vld [vmem:[#allocation5 + $0x78] sm:$0xff]  ;;  %v2009_v22 = vld [vmem:[#allocation5 + $0x68] sm:$0xff] }
 0x1e9   :  { %v2019_v17 = vld [vmem:[#allocation5 + $0xb8] sm:$0xff]  ;;  %811 = vmatpush.bf16.msrb.mxu1 %v2011_v15  ;;  %v2005_v33 = vld [vmem:[#allocation5 + $0x48] sm:$0xff] }
 0x1ea   :  { %v494_v38 = vmul.f32 %v2313_v34, %v2313_v34  ;;  %v495_v39 = vmul.f32 %v2315_v35, %v2315_v35  ;;  %v496_v40 = vmul.f32 %v2317_v36, %v2317_v36  ;;  %v497_v42 = vmul.f32 %v2319_v37, %v2319_v37 }
 0x1ec   :  { %v498_v41 = vadd.f32 %v495_v39, %v494_v38  ;;  %v2001_v38 = vld [vmem:[#allocation5 + $0x28] sm:$0xff]  ;;  %v2015_v39 = vld [vmem:[#allocation5 + $0x98] sm:$0xff] }
 0x1ed   :  { %812 = vmatpush.bf16.msrb.mxu1 %v2010_v18  ;;  %880 = vmatpush.bf16.msrb.mxu2 %v2001_v38 }
 0x1ee   :  { %v499_v43 = vadd.f32 %v498_v41, %v496_v40  ;;  %v2004_v40 = vld [vmem:[#allocation5 + $0x40] sm:$0xff] }
 0x1ef   :  { %v2000_v41 = vld [vmem:[#allocation5 + $0x20] sm:$0xff] }
 0x1f0   :  { %v500_v44 = vadd.f32 %v499_v43, %v497_v42  ;;  %v2014_v42 = vld [vmem:[#allocation5 + $0x90] sm:$0xff]  ;;  %v1999_v43 = vld [vmem:[#allocation5 + $0x18] sm:$0xff] }
 0x1f1   :  { %813 = vmatpush.bf16.msrb.mxu1 %v2009_v22  ;;  %881 = vmatpush.bf16.msrb.mxu2 %v2000_v41 }
 0x1f2   :  { %v501_v46 = vrot.slane %v500_v44, 4 }
 0x1f4   :  { %v502_v48 = vadd.f32 %v501_v46, %v500_v44  ;;  %v2013_v44 = vld [vmem:[#allocation5 + $0x88] sm:$0xff]  ;;  %v1998_v46 = vld [vmem:[#allocation5 + $0x10] sm:$0xff] }
 0x1f5   :  { %814 = vmatpush.bf16.msrb.mxu1 %v2008_v23  ;;  %882 = vmatpush.bf16.msrb.mxu2 %v1999_v43 }
 0x1f6   :  { %v503_v49 = vrot.slane %v502_v48, 2 }
 0x1f8   :  { %v504_v50 = vadd.f32 %v503_v49, %v502_v48  ;;  %v2012_v48 = vld [vmem:[#allocation5 + $0x80] sm:$0xff]  ;;  %v1997_v49 = vld [vmem:[#allocation5 + $0x8] sm:$0xff] }
 0x1f9   :  { %815 = vmatpush.bf16.msrb.mxu1 %v2007_v25  ;;  %883 = vmatpush.bf16.msrb.mxu2 %v1998_v46 }
 0x1fa   :  { %v505_v51 = vrot.slane %v504_v50, 1 }
 0x1fc   :  { %v506_v52 = vadd.f32 %v505_v51, %v504_v50  ;;  %v1996_v50 = vld [vmem:[#allocation5] sm:$0xff] }
 0x1fd   :  { %816 = vmatpush.bf16.msrb.mxu1 %v2006_v30  ;;  %884 = vmatpush.bf16.msrb.mxu2 %v1997_v49 }
 0x1fe   :  { %523 = vmatmul.f32.vlgmr.msra.gmra.mxu3 %v506_v52 }
 0x1ff   :  { %582 = vmatpush.msra.mxu3 %v2306_v1 }
 0x201   :  { %817 = vmatpush.bf16.msrb.mxu1 %v2005_v33  ;;  %885 = vmatpush.bf16.msrb.mxu2 %v1996_v50 }
 0x205   :  { %818 = vmatpush.bf16.msrb.mxu1 %v2004_v40  ;;  %1085 = vmatpush.xpose.msra.mxu2 %v2306_v1 }
 0x209   :  { %1047 = vmatpush.msra.mxu1 %v2306_v1 }
 0x281   :  { %v524_v53 = vpop.f32.mrf.mxu3 }
 0x282   :  { %v527_v54 = vmul.f32 0.001953125, %v524_v53 }
 0x284   :  { %v528_v55 = vadd.f32 1e-05, %v527_v54 }
 0x286   :  { %2065 = vrsqrt.f32 %v528_v55  ;;  %vm535_vm13 = vweird.f32 %v528_v55 }
 0x28c   :  { %v2066_v56 = vpop.eup %2065 }
 0x28d   :  { %v530_v57 = vmul.f32 %v2066_v56, %v528_v55  ;;  %vm536_vm12 = vweird.f32 %v2066_v56 }
 0x28e   :  { %vm537_vm14 = vmor %vm535_vm13, %vm536_vm12 }
 0x28f   :  { %v531_v58 = vmul.f32 %v2066_v56, %v530_v57 }
 0x291   :  { %v532_v59 = vmul.f32 0.5, %v531_v58 }
 0x293   :  { %v533_v61 = vsub.f32 1.5, %v532_v59 }
 0x295   :  { %v534_v0 = vmul.f32 %v2066_v56, %v533_v61 }
 0x297   :  { %v538_v2 = vsel %vm537_vm14, %v2066_v56, %v534_v0 }
 0x298   :  { %v539_v4 = vmul.f32 %v538_v2, %v2333_v63 }
 0x29a   :  { %1695 = vmatmul.msk.f32.vlgmr.msrb.gmra.mxu3 %vm465_vm11, %v539_v4 }
 0x29b   :  { %629 = vmatpush.bf16.msrb.mxu3 %v1995_v3 }
 0x29f   :  { %630 = vmatpush.bf16.msrb.mxu3 %v1994_v5 }
 0x2a2   :  { %1696 = vmatmul.msk.f32.vlgmr.msra.gmra.mxu3 %vm465_vm11, %v564_v6 }
 0x2a3   :  { %655 = vmatpush.msra.mxu3 %v2306_v1 }
 0x2aa   :  { %1705 = vmatmul.msk.bf16.vlgmr.msrb.gmra.mxu3 %vm619_vm15, %v601_v7 }
 0x2ab   :  { %976 = vmatpush.bf16.msrb.mxu3 %v2019_v17 }
 0x2af   :  { %977 = vmatpush.bf16.msrb.mxu3 %v2018_v19 }
 0x2b3   :  { %978 = vmatpush.bf16.msrb.mxu3 %v2017_v29 }
 0x2b7   :  { %979 = vmatpush.bf16.msrb.mxu3 %v2016_v32 }
 0x2bb   :  { %980 = vmatpush.bf16.msrb.mxu3 %v2015_v39 }
 0x2bf   :  { %981 = vmatpush.bf16.msrb.mxu3 %v2014_v42 }
 0x2c3   :  { %982 = vmatpush.bf16.msrb.mxu3 %v2013_v44 }
 0x2c7   :  { %983 = vmatpush.bf16.msrb.mxu3 %v2012_v48 }
 0x31d   :  { %v2350_v8 = vpop.f32.mrf.mxu3 }
 0x31e   :  { %v587_v51 = vperm.slane %v2350_v8, 0 }
 0x320   :  { %v588_v54 = vmul.f32 %v587_v51, %v2313_v34  ;;  %v589_v55 = vmul.f32 %v587_v51, %v2315_v35  ;;  %v590_v3 = vmul.f32 %v587_v51, %v2317_v36  ;;  %v591_v35 = vmul.f32 %v587_v51, %v2319_v37 }
 0x325   :  { %v2352_v9 = vpop.f32.mrf.mxu3 }
 0x326   :  { %v2378_v52 = vperm.slane %v2352_v9, 0 }
 0x328   :  { %v593_v56 = vadd.f32 %v2378_v52, %v588_v54  ;;  %v594_v57 = vadd.f32 %v2378_v52, %v589_v55  ;;  %v595_v4 = vadd.f32 %v2378_v52, %v590_v3 }
 0x32a   :  { %v597_v58 = vmax.f32 %v593_v56, 0.0  ;;  %v598_v59 = vmax.f32 %v594_v57, 0.0  ;;  %v599_v5 = vmax.f32 %v595_v4, 0.0 }
 0x32d   :  { %v632_v11 = vpop.f32.mrf.mxu3 }
 0x32e   :  { %v633_v12 = vadd.f32 %v632_v11, %v606_v10  ;;  %v596_v10 = vadd.f32 %v2378_v52, %v591_v35 }
 0x330   :  { %v636_v13 = vmax.f32 %v633_v12, 0.0 }
 0x332   :  { %1706 = vmatmul.msk.f32.vlgmr.msra.gmra.mxu3 %vm465_vm11, %v636_v13  ;;  %v600_v13 = vmax.f32 %v596_v10, 0.0 }
 0x335   :  { %v634_v14 = vpop.f32.mrf.mxu3 }
 0x3b5   :  { %v657_v21 = vpop.f32.mrf.mxu3 }
 0x3b6   :  { %1707 = vmatpush.msk.msrb.mxu0 %vm677_vm2, %v657_v21 }
 0x3b7   :  { %1708 = vmatmul.msk.f32.vlgmr.msrb.gmra.mxu0 %vm664_vm3, %v660_v20 }
 0x3b8   :  { %1023 = vmatpush.xpose.msra.mxu0 %v2306_v1 }
 0x3bc   :  { %1121 = vmatpush.msrb.mxu0 %v2306_v1 }
 0x3bf   :  { %1709 = vmatmul.msk.f32.gmra.mxu0 %vm664_vm3, %v661_v24 }
 0x3c7   :  { %1710 = vmatmul.msk.f32.gmra.mxu0 %vm664_vm3, %v662_v26 }
 0x3cf   :  { %1711 = vmatmul.msk.f32.gmra.mxu0 %vm664_vm3, %v663_v27 }
 0x434   :  { %v698_v53 = vpop.f32.mrf.mxu0 }
 0x435   :  { %v710_v0 = vadd.f32 %v698_v53, %v597_v58 }
 0x437   :  { %v897_v8 = vrot.slane %v710_v0, 1  ;;  %v714_v18 = vrot.slane %v710_v0, 7 }
 0x43c   :  { %v701_v61 = vpop.f32.mrf.mxu0 }
 0x43d   :  { %v711_v2 = vadd.f32 %v701_v61, %v598_v59 }
 0x43f   :  { %v744_v1 = vpack.c.bf16 %v711_v2, %v710_v0  ;;  %v898_v34 = vrot.slane %v711_v2, 1  ;;  %v715_v15 = vrot.slane %v711_v2, 7 }
 0x441   :  { %819 = vmatmul.bf16.vlgmr.msrb.gmra.mxu1 %v744_v1  ;;  %v903_v11 = vsel %vm332_vm1, %v897_v8, %v898_v34  ;;  %v720_v20 = vsel %vm93_vm0, %v714_v18, %v715_v15 }
 0x444   :  { %v704_v6 = vpop.f32.mrf.mxu0 }
 0x445   :  { %v712_v7 = vadd.f32 %v704_v6, %v599_v5 }
 0x447   :  { %v899_v9 = vrot.slane %v712_v7, 1  ;;  %v716_v26 = vrot.slane %v712_v7, 7 }
 0x449   :  { %v902_v36 = vsel %vm332_vm1, %v898_v34, %v899_v9  ;;  %v719_v28 = vsel %vm93_vm0, %v715_v15, %v716_v26 }
 0x44a   :  { %v1815_v12 = vpack.c.bf16 %v902_v36, %v903_v11 }
 0x44c   :  { %v707_v14 = vpop.f32.mrf.mxu0  ;;  %1816 = vmatmul.msk.bf16.vlgmr.msrb.gmra.mxu3 %vm2271_vm6, %v1815_v12 }
 0x44d   :  { %v713_v17 = vadd.f32 %v707_v14, %v600_v13 }
 0x44f   :  { %v717_v37 = vrot.slane %v713_v17, 7  ;;  %v745_v19 = vpack.c.bf16 %v713_v17, %v712_v7  ;;  %v900_v23 = vrot.slane %v713_v17, 1 }
 0x451   :  { %824 = vmatmul.bf16.gmra.mxu1 %v745_v19  ;;  %v721_v21 = vsel %vm93_vm0, %v717_v37, %v714_v18  ;;  %v901_v47 = vsel %vm332_vm1, %v899_v9, %v900_v23  ;;  %v904_v24 = vsel %vm332_vm1, %v900_v23, %v897_v8  ;;  %v718_v27 = vsel %vm93_vm0, %v716_v26, %v717_v37 }
 0x452   :  { %v1777_v22 = vpack.c.bf16 %v720_v20, %v721_v21  ;;  %v1818_v25 = vpack.c.bf16 %v904_v24, %v901_v47  ;;  %v1780_v29 = vpack.c.bf16 %v718_v27, %v719_v28 }
 0x454   :  { %1778 = vmatmul.msk.bf16.vlgmr.msrb.gmra.mxu2 %vm2266_vm5, %v1777_v22 }
 0x45c   :  { %1819 = vmatmul.msk.bf16.gmra.mxu3 %vm2295_vm10, %v1818_v25 }
 0x464   :  { %1781 = vmatmul.msk.bf16.gmra.mxu2 %vm2290_vm9, %v1780_v29 }
 0x4be   :  { %v820_v45 = vpop.f32.mrf.mxu1 }
 0x4c6   :  { %v822_v32 = vpop.f32.mrf.mxu1 }
 0x4ce   :  { %v825_v39 = vpop.f32.mrf.mxu1 }
 0x4cf   :  { %v985_v30 = vpop.f32.mrf.mxu3 }
 0x4d6   :  { %v827_v48 = vpop.f32.mrf.mxu1 }
 0x4d7   :  { %v887_v31 = vpop.f32.mrf.mxu2  ;;  %v987_v33 = vpop.f32.mrf.mxu3 }
 0x4d8   :  { %v888_v42 = vadd.f32 %v887_v31, %v820_v45 }
 0x4da   :  { %v995_v46 = vadd.f32 %v985_v30, %v888_v42 }
 0x4df   :  { %v889_v38 = vpop.f32.mrf.mxu2  ;;  %v990_v62 = vpop.f32.mrf.mxu3 }
 0x4e0   :  { %v890_v41 = vadd.f32 %v889_v38, %v822_v32 }
 0x4e2   :  { %v996_v44 = vadd.f32 %v987_v33, %v890_v41 }
 0x4e4   :  { %v999_v50 = vadd.f32 %v996_v44, %v995_v46 }
 0x4e7   :  { %v892_v40 = vpop.f32.mrf.mxu2  ;;  %v992_v51 = vpop.f32.mrf.mxu3 }
 0x4e8   :  { %v893_v43 = vadd.f32 %v892_v40, %v825_v39 }
 0x4ea   :  { %v997_v16 = vadd.f32 %v990_v62, %v893_v43 }
 0x4ec   :  { %v1000_v53 = vadd.f32 %v999_v50, %v997_v16  ;;  %v2022_v50 = vld [vmem:[%s2442_s3 + $0x10] sm:$0xff] }
 0x4ef   :  { %v894_v49 = vpop.f32.mrf.mxu2 }
 0x4f0   :  { %v895_v60 = vadd.f32 %v894_v49, %v827_v48  ;;  %v2020_v48 = vld [vmem:[%s2442_s3] sm:$0xff]  ;;  %v2021_v49 = vld [vmem:[%s2442_s3 + $0x8] sm:$0xff] }
 0x4f2   :  { %v998_v54 = vadd.f32 %v992_v51, %v895_v60  ;;  %v2023_v60 = vld [vmem:[%s2442_s3 + $0x18] sm:$0xff]  ;;  %v2030_v51 = vld [vmem:[#allocation7 + $0x30] sm:$0xff]  ;;  %s2177_s3 = smov [#allocation8]  }
 0x4f3   :  { %s1570_s28 = sshll.u32 %s2177_s3, 4  ;;  %s1571_s28 = int_to_ptr.vmem [resolvable:$true] %s1570_s28 }
 0x4f4   :  { %v1001_v55 = vadd.f32 %v1000_v53, %v998_v54  ;;  %v2029_v53 = vld [vmem:[#allocation7 + $0x28] sm:$0xff] }
 0x4f6   :  { %v1002_v56 = vrot.slane %v1001_v55, 4 }
 0x4f8   :  { %v1003_v57 = vadd.f32 %v1002_v56, %v1001_v55  ;;  %v2039_v55 = vld [vmem:[#allocation7 + $0x78] sm:$0xff] }
 0x4f9   :  { %v2027_v56 = vld [vmem:[#allocation7 + $0x18] sm:$0xff]  ;;  %1305 = vmatpush.bf16.msra.mxu3 %v2039_v55 }
 0x4fa   :  { %v1004_v58 = vrot.slane %v1003_v57, 2 }
 0x4fc   :  { %v1005_v59 = vadd.f32 %v1004_v58, %v1003_v57  ;;  %v2038_v57 = vld [vmem:[#allocation7 + $0x70] sm:$0xff] }
 0x4fd   :  { %v2026_v58 = vld [vmem:[#allocation7 + $0x10] sm:$0xff]  ;;  %1306 = vmatpush.bf16.msra.mxu3 %v2038_v57 }
 0x4fe   :  { %v1006_v61 = vrot.slane %v1005_v59, 1 }
 0x500   :  { %v1007_v0 = vadd.f32 %v1006_v61, %v1005_v59  ;;  %v2037_v59 = vld [vmem:[#allocation7 + $0x68] sm:$0xff] }
 0x501   :  { %v2025_v61 = vld [vmem:[#allocation7 + $0x8] sm:$0xff]  ;;  %1307 = vmatpush.bf16.msra.mxu3 %v2037_v59 }
 0x502   :  { %1024 = vmatmul.f32.vlgmr.msra.gmra.mxu0 %v1007_v0  ;;  %v2036_v0 = vld [vmem:[#allocation7 + $0x60] sm:$0xff] }
 0x505   :  { %1308 = vmatpush.bf16.msra.mxu3 %v2036_v0 }
 0x57f   :  { %v1025_v2 = vpop.f32.mrf.mxu0 }
 0x580   :  { %v1028_v3 = vmul.f32 0.001953125, %v1025_v2  ;;  %v2024_v2 = vld [vmem:[#allocation7] sm:$0xff] }
 0x582   :  { %1820 = vmatmul.msk.f32.vlgmr.msra.gmra.mxu1 %vm465_vm11, %v1028_v3  ;;  %v2035_v3 = vld [vmem:[#allocation7 + $0x58] sm:$0xff] }
 0x583   :  { %1309 = vmatpush.bf16.msra.mxu3 %v2035_v3 }
 0x5ff   :  { %v1049_v1 = vpop.f32.mrf.mxu1 }
 0x600   :  { %v1052_v4 = vperm.slane %v1049_v1, 0  ;;  %v2047_v1 = vld [vmem:[#allocation7 + $0xb8] sm:$0xff] }
 0x601   :  { %1458 = vmatpush.bf16.msra.mxu0 %v2047_v1 }
 0x602   :  { %v1053_v5 = vsub.f32 %v995_v46, %v1052_v4  ;;  %v1054_v6 = vsub.f32 %v996_v44, %v1052_v4  ;;  %v1055_v34 = vsub.f32 %v997_v16, %v1052_v4  ;;  %v1056_v7 = vsub.f32 %v998_v54, %v1052_v4  ;;  %v2028_v54 = vld [vmem:[#allocation7 + $0x20] sm:$0xff]  ;;  %v2034_v4 = vld [vmem:[#allocation7 + $0x50] sm:$0xff] }
 0x603   :  { %1310 = vmatpush.bf16.msra.mxu3 %v2034_v4 }
 0x604   :  { %v1057_v35 = vmul.f32 %v1053_v5, %v1053_v5  ;;  %v1058_v8 = vmul.f32 %v1054_v6, %v1054_v6  ;;  %v1059_v9 = vmul.f32 %v1055_v34, %v1055_v34  ;;  %v1060_v11 = vmul.f32 %v1056_v7, %v1056_v7 }
 0x606   :  { %v1061_v10 = vadd.f32 %v1058_v8, %v1057_v35  ;;  %v2044_v35 = vld [vmem:[#allocation7 + $0xa0] sm:$0xff]  ;;  %v2043_v8 = vld [vmem:[#allocation7 + $0x98] sm:$0xff] }
 0x608   :  { %v1062_v36 = vadd.f32 %v1061_v10, %v1059_v9  ;;  %v2055_v9 = vld [vmem:[#allocation7 + $0xf8] sm:$0xff] }
 0x60a   :  { %v1063_v12 = vadd.f32 %v1062_v36, %v1060_v11  ;;  %v2042_v11 = vld [vmem:[#allocation7 + $0x90] sm:$0xff] }
 0x60b   :  { %v2054_v36 = vld [vmem:[#allocation7 + $0xf0] sm:$0xff] }
 0x60c   :  { %v1064_v13 = vrot.slane %v1063_v12, 4 }
 0x60e   :  { %v1065_v14 = vadd.f32 %v1064_v13, %v1063_v12  ;;  %v2041_v12 = vld [vmem:[#allocation7 + $0x88] sm:$0xff] }
 0x60f   :  { %v2053_v13 = vld [vmem:[#allocation7 + $0xe8] sm:$0xff] }
 0x610   :  { %v1066_v15 = vrot.slane %v1065_v14, 2 }
 0x612   :  { %v1067_v17 = vadd.f32 %v1066_v15, %v1065_v14 }
 0x614   :  { %v1068_v18 = vrot.slane %v1067_v17, 1 }
 0x616   :  { %v1069_v37 = vadd.f32 %v1068_v18, %v1067_v17  ;;  %v2040_v18 = vld [vmem:[#allocation7 + $0x80] sm:$0xff] }
 0x618   :  { %1086 = vmatmul.f32.vlgmr.msra.gmra.mxu2 %v1069_v37  ;;  %v2052_v37 = vld [vmem:[#allocation7 + $0xe0] sm:$0xff] }
 0x69b   :  { %v1087_v19 = vpop.f32.mrf.mxu2 }
 0x69c   :  { %v1090_v20 = vmul.f32 0.001953125, %v1087_v19 }
 0x69e   :  { %v1091_v21 = vadd.f32 1e-05, %v1090_v20 }
 0x6a0   :  { %2067 = vrsqrt.f32 %v1091_v21  ;;  %vm1098_vm1 = vweird.f32 %v1091_v21 }
 0x6a6   :  { %v2068_v22 = vpop.eup %2067 }
 0x6a7   :  { %v1093_v23 = vmul.f32 %v2068_v22, %v1091_v21  ;;  %vm1099_vm0 = vweird.f32 %v2068_v22 }
 0x6a8   :  { %vm1100_vm4 = vmor %vm1098_vm1, %vm1099_vm0 }
 0x6a9   :  { %v1094_v47 = vmul.f32 %v2068_v22, %v1093_v23 }
 0x6ab   :  { %v1095_v24 = vmul.f32 0.5, %v1094_v47  ;;  %v2050_v47 = vld [vmem:[#allocation7 + $0xd0] sm:$0xff] }
 0x6ad   :  { %v1096_v25 = vsub.f32 1.5, %v1095_v24  ;;  %v2049_v24 = vld [vmem:[#allocation7 + $0xc8] sm:$0xff] }
 0x6af   :  { %v1097_v26 = vmul.f32 %v2068_v22, %v1096_v25 }
 0x6b1   :  { %v1101_v27 = vsel %vm1100_vm4, %v2068_v22, %v1097_v26  ;;  %v2051_v22 = vld [vmem:[#allocation7 + $0xd8] sm:$0xff] }
 0x6b2   :  { %v1102_v28 = vmul.f32 %v1101_v27, %v2333_v63 }
 0x6b4   :  { %1821 = vmatmul.msk.f32.vlgmr.msrb.gmra.mxu0 %vm465_vm11, %v1102_v28  ;;  %v2048_v28 = vld [vmem:[#allocation7 + $0xc0] sm:$0xff] }
 0x731   :  { %v1123_v29 = vpop.f32.mrf.mxu0 }
 0x732   :  { %v1126_v45 = vperm.slane %v1123_v29, 0 }
 0x734   :  { %v1129_v30 = vmul.f32 %v1126_v45, %v1055_v34  ;;  %v1130_v31 = vmul.f32 %v1126_v45, %v1056_v7  ;;  %v1127_v32 = vmul.f32 %v1126_v45, %v1053_v5  ;;  %v1128_v33 = vmul.f32 %v1126_v45, %v1054_v6  ;;  %v2046_v5 = vld [vmem:[#allocation7 + $0xb0] sm:$0xff]  ;;  %v2033_v6 = vld [vmem:[#allocation7 + $0x48] sm:$0xff]  ;;  %v2032_v7 = vld [vmem:[#allocation7 + $0x40] sm:$0xff] }
 0x735   :  { %1459 = vmatpush.bf16.msra.mxu0 %v2046_v5  ;;  %v2045_v34 = vld [vmem:[#allocation7 + $0xa8] sm:$0xff]  ;;  %1311 = vmatpush.bf16.msra.mxu3 %v2033_v6 }
 0x736   :  { %v1133_v38 = vadd.f32 %v1129_v30, %v2378_v52  ;;  %v1134_v39 = vadd.f32 %v1130_v31, %v2378_v52  ;;  %v1131_v62 = vadd.f32 %v1127_v32, %v2378_v52  ;;  %v1132_v40 = vadd.f32 %v1128_v33, %v2378_v52  ;;  %v2031_v52 = vld [vmem:[#allocation7 + $0x38] sm:$0xff] }
 0x737   :  { %1373 = vmatpush.bf16.msrb.mxu2 %v2031_v52 }
 0x738   :  { %v1137_v41 = vmax.f32 %v1133_v38, 0.0  ;;  %v1138_v42 = vmax.f32 %v1134_v39, 0.0  ;;  %v1135_v44 = vmax.f32 %v1131_v62, 0.0  ;;  %v1136_v46 = vmax.f32 %v1132_v40, 0.0 }
 0x739   :  { %1460 = vmatpush.bf16.msra.mxu0 %v2045_v34  ;;  %1312 = vmatpush.bf16.msra.mxu3 %v2032_v7 }
 0x73a   :  { %v1148_v43 = vpack.c.bf16 %v1138_v42, %v1137_v41  ;;  %v1147_v16 = vpack.c.bf16 %v1136_v46, %v1135_v44 }
 0x73b   :  { %1374 = vmatpush.bf16.msrb.mxu2 %v2030_v51 }
 0x73c   :  { %1187 = vmatpush.bf16.msrb.mxu1 %v1148_v43 }
 0x73d   :  { %1461 = vmatpush.bf16.msra.mxu0 %v2044_v35  ;;  %1545 = vmatpush.bf16.msrb.mxu3 %v2055_v9 }
 0x73f   :  { %1375 = vmatpush.bf16.msrb.mxu2 %v2029_v53 }
 0x740   :  { %1188 = vmatpush.bf16.msrb.mxu1 %v1147_v16 }
 0x741   :  { %1462 = vmatpush.bf16.msra.mxu0 %v2043_v8  ;;  %1546 = vmatpush.bf16.msrb.mxu3 %v2054_v36 }
 0x743   :  { %1838 = vmatmul.msk.bf16.vlgmr.msrb.gmra.mxu1 %vm619_vm15, %v2020_v48  ;;  %1376 = vmatpush.bf16.msrb.mxu2 %v2028_v54  ;;  %v1561_v54 = vperm.slane %v2333_v63, 3 }
 0x745   :  { %1463 = vmatpush.bf16.msra.mxu0 %v2042_v11  ;;  %1547 = vmatpush.bf16.msrb.mxu3 %v2053_v13 }
 0x747   :  { %1377 = vmatpush.bf16.msrb.mxu2 %v2027_v56 }
 0x749   :  { %1464 = vmatpush.bf16.msra.mxu0 %v2041_v12  ;;  %1548 = vmatpush.bf16.msrb.mxu3 %v2052_v37 }
 0x74b   :  { %1378 = vmatpush.bf16.msrb.mxu2 %v2026_v58 }
 0x74d   :  { %1465 = vmatpush.bf16.msra.mxu0 %v2040_v18  ;;  %1549 = vmatpush.bf16.msrb.mxu3 %v2051_v22 }
 0x74f   :  { %1379 = vmatpush.bf16.msrb.mxu2 %v2025_v61 }
 0x751   :  { %1550 = vmatpush.bf16.msrb.mxu3 %v2050_v47 }
 0x753   :  { %1839 = vmatmul.msk.bf16.gmra.mxu1 %vm619_vm15, %v2021_v49  ;;  %1380 = vmatpush.bf16.msrb.mxu2 %v2024_v2 }
 0x755   :  { %1551 = vmatpush.bf16.msrb.mxu3 %v2049_v24 }
 0x759   :  { %1552 = vmatpush.bf16.msrb.mxu3 %v2048_v28 }
 0x763   :  { %1840 = vmatmul.msk.bf16.gmra.mxu1 %vm619_vm15, %v2022_v50 }
 0x773   :  { %1841 = vmatmul.msk.bf16.gmra.mxu1 %vm619_vm15, %v2023_v60 }
 0x7c0   :  { %v1190_v10 = vpop.f32.mrf.mxu1 }
 0x7c1   :  { %v1210_v14 = vpack.c.bf16 %v1190_v10, %v1190_v10 }
 0x7c3   :  { %v1321_v19 = vunpack.c.l.b16 %v1210_v14 }
 0x7c8   :  { %v1192_v15 = vpop.f32.mrf.mxu1 }
 0x7c9   :  { %v1211_v17 = vpack.c.bf16 %v1192_v15, %v1192_v15 }
 0x7cb   :  { %v1322_v20 = vunpack.c.l.b16 %v1211_v17 }
 0x7cd   :  { %v1323_v21 = vpack.c.b16 %v1322_v20, %v1321_v19 }
 0x7cf   :  { %1381 = vmatmul.bf16.vlgmr.msrb.gmra.mxu2 %v1323_v21 }
 0x7d0   :  { %v1195_v23 = vpop.f32.mrf.mxu1 }
 0x7d1   :  { %v1212_v25 = vpack.c.bf16 %v1195_v23, %v1195_v23 }
 0x7d3   :  { %v1253_v29 = vunpack.c.l.b16 %v1212_v25 }
 0x7d8   :  { %v1197_v26 = vpop.f32.mrf.mxu1 }
 0x7d9   :  { %v1213_v27 = vpack.c.bf16 %v1197_v26, %v1197_v26 }
 0x7db   :  { %v1254_v45 = vunpack.c.l.b16 %v1213_v27 }
 0x7dd   :  { %v1255_v30 = vpack.c.b16 %v1254_v45, %v1253_v29 }
 0x7df   :  { %1313 = vmatmul.bf16.vlgmr.msra.gmra.mxu3 %v1255_v30 }
 0x7e0   :  { %v1200_v31 = vpop.f32.mrf.mxu1 }
 0x7e1   :  { %v1214_v32 = vpack.c.bf16 %v1200_v31, %v1200_v31 }
 0x7e3   :  { %v1406_v39 = vunpack.c.l.b16 %v1214_v32 }
 0x7e8   :  { %v1202_v33 = vpop.f32.mrf.mxu1 }
 0x7e9   :  { %v1215_v38 = vpack.c.bf16 %v1202_v33, %v1202_v33 }
 0x7eb   :  { %v1407_v62 = vunpack.c.l.b16 %v1215_v38 }
 0x7ed   :  { %v1408_v40 = vpack.c.b16 %v1407_v62, %v1406_v39 }
 0x7ef   :  { %1466 = vmatmul.bf16.vlgmr.msra.gmra.mxu0 %v1408_v40 }
 0x7f0   :  { %v1205_v41 = vpop.f32.mrf.mxu1 }
 0x7f1   :  { %v1216_v42 = vpack.c.bf16 %v1205_v41, %v1205_v41 }
 0x7f3   :  { %v1493_v46 = vunpack.c.l.b16 %v1216_v42 }
 0x7f8   :  { %v1207_v43 = vpop.f32.mrf.mxu1 }
 0x7f9   :  { %v1217_v44 = vpack.c.bf16 %v1207_v43, %v1207_v43 }
 0x7fb   :  { %v1494_v16 = vunpack.c.l.b16 %v1217_v44 }
 0x7fd   :  { %v1495_v48 = vpack.c.b16 %v1494_v16, %v1493_v46 }
 0x7ff   :  { %1553 = vmatmul.bf16.vlgmr.msrb.gmra.mxu3 %v1495_v48 }
 0x852   :  { %v1382_v50 = vpop.f32.mrf.mxu2 }
 0x85a   :  { %v1384_v58 = vpop.f32.mrf.mxu2 }
 0x862   :  { %v1314_v49 = vpop.f32.mrf.mxu3 }
 0x863   :  { %v1383_v51 = vadd.f32 %v1382_v50, %v1314_v49 }
 0x86a   :  { %v1316_v52 = vpop.f32.mrf.mxu3 }
 0x86b   :  { %v1385_v61 = vadd.f32 %v1384_v58, %v1316_v52 }
 0x86c   :  { %v1467_v60 = vpop.f32.mrf.mxu0 }
 0x86d   :  { %v1472_v53 = vadd.f32 %v1467_v60, %v1383_v51 }
 0x874   :  { %v1469_v59 = vpop.f32.mrf.mxu0 }
 0x875   :  { %v1473_v0 = vadd.f32 %v1469_v59, %v1385_v61 }
 0x882   :  { %v1554_v55 = vpop.f32.mrf.mxu3 }
 0x883   :  { %v1559_v56 = vadd.f32 %v1554_v55, %v1472_v53 }
 0x885   :  { %v1562_v57 = vadd.f32 %v1561_v54, %v1559_v56 }
 0x887   :  { %1564 = vst [vmem:[#allocation8] sm:$0xff] %v1562_v57 }
 0x88a   :  { %v1556_v2 = vpop.f32.mrf.mxu3 }
 0x88b   :  { %v1560_v3 = vadd.f32 %v1556_v2, %v1473_v0 }
 0x88d   :  { %v1563_v1 = vadd.f32 %v1561_v54, %v1560_v3 }
 0x88f   :  { %1565 = vst [vmem:[#allocation8 + $0x8] sm:$0xff] %v1563_v1 }
 0x890   :  { %1578 = dma.vmem_to_hbm [thread:$0]  %s1571_s28, 256, %s1573_s0, [#allocation4], %s2178_s10, %s2178_s10, %s2179_s11  }
 0x891   :  { %2169 = dma.done.wait [#allocation4], 256  }
 0x892   :  { %2170 = vsyncadd [#allocation4], 4294967040 }
 0x893   :  { %1583 = vsyncpa [#allocation3], 1 }
 0x894   :  { %1584 = vsyncpa [#allocation6], 1 }
 0x895   :  { %1585 = vsyncpa [#allocation4], 1 }

</bundles_post_ra>
